<compile_context>
chip_gen: v7x
topology: tpu7x:2x2x1
jax: 0.10.0
libtpu: 0.0.40
codegen_flags: <defaults>
</compile_context>

<pallas_src>
import jax
import jax.numpy as jnp
from jax.experimental import pallas as pl
from jax.experimental.pallas import tpu as pltpu

EMBED = 32            # embedding_size
N_COND = 4            # n_conditions
H = W = 384           # implied by nn.Linear(in_features=576): (384 / 16) ** 2 == 576
STRIDE = 16           # 4 chained stride-2, k=1 convs == ::16 subsample
SUB = W // STRIDE     # 24 subsampled rows / cols
DS_FEAT = SUB * SUB   # 576
DS_OUT = 128
OUT_DIM = EMBED + DS_OUT
EPS = 1e-10


def _fused_kernel(cw_ref, x_ref, xds_ref, ew_ref, eb_ref, m_ref, lw_ref, lb_ref,
                  out_ref):
    # ---- embeddingnet branch: global average pool of the RGB slab folded into
    #      a Linear(3 -> EMBED).
    # TODO(synk): the real embeddingnet is an externally injected module in the
    # PyTorch spec; a GAP + Linear(3 -> EMBED) stand-in is what is fused here.
    colsum = jnp.concatenate(
        [jnp.sum(x_ref[c], axis=0, keepdims=True) for c in range(3)],
        axis=0)                                                     # (3, W)  sublane reduce
    pooled = jnp.sum(colsum, axis=1, keepdims=True) * (1.0 / float(H * W))  # (3, 1) one lane reduce
    gx = jnp.sum(pooled * ew_ref[...], axis=0, keepdims=True) + eb_ref[...]  # (1, EMBED)

    # ---- condition branch, vectorized over all N_COND learned masks
    #      (learnedmask=True): embedded_x = sum_c L2_normalize(gx * relu(mask_c)).
    masks = jnp.maximum(m_ref[...], 0.0)                            # (N_COND, EMBED)
    me = gx * masks                                                 # (N_COND, EMBED)
    norm = jnp.sqrt(jnp.sum(me * me, axis=1, keepdims=True)) + EPS
    emb = jnp.sum(me / norm, axis=0, keepdims=True)                 # (1, EMBED)

    # ---- downsample branch: pre-strided ::16 pixels of channel 3, one MXU dot
    #      against the resident Linear(576, 128) weights; conv-scalar product
    #      applied after the matmul, then bias and L2 norm.
    scale = cw_ref[0] * cw_ref[1] * cw_ref[2] * cw_ref[3]           # SMEM scalars
    z = jnp.dot(xds_ref[...], lw_ref[...],
                preferred_element_type=jnp.float32) * scale + lb_ref[...]   # (1, DS_OUT)
    zn = jnp.sqrt(jnp.sum(z * z, axis=1, keepdims=True)) + EPS

    out_ref[...] = jnp.concatenate([emb, z / zn], axis=1)           # (1, EMBED + 128)


def conditional_simnet_forward(x, params):
    B = x.shape[0]

    # Tiny wrapper-side pre-slice of channel 3: exactly the pixels the four
    # k=1 stride-2 convs keep, in torch Flatten (row-major) order.
    x_ds = x[:, 3, ::STRIDE, ::STRIDE].reshape(B, 1, DS_FEAT)

    emb_b = params["emb_b"].reshape(1, EMBED)
    lin_b = params["lin_b"].reshape(1, DS_OUT)

    out = pl.pallas_call(
        _fused_kernel,
        out_shape=jax.ShapeDtypeStruct((B, 1, OUT_DIM), jnp.float32),
        grid=(B,),
        in_specs=[
            pl.BlockSpec(memory_space=pltpu.MemorySpace.SMEM),             # conv_w (4,)
            pl.BlockSpec((None, 3, H, W), lambda b: (b, 0, 0, 0)),         # RGB slab only
            pl.BlockSpec((None, 1, DS_FEAT), lambda b: (b, 0, 0)),         # pre-strided ch-3
            pl.BlockSpec((3, EMBED), lambda b: (0, 0)),                    # emb_w (resident)
            pl.BlockSpec((1, EMBED), lambda b: (0, 0)),                    # emb_b (resident)
            pl.BlockSpec((N_COND, EMBED), lambda b: (0, 0)),               # masks (resident)
            pl.BlockSpec((DS_FEAT, DS_OUT), lambda b: (0, 0)),             # lin_w (resident)
            pl.BlockSpec((1, DS_OUT), lambda b: (0, 0)),                   # lin_b (resident)
        ],
        out_specs=pl.BlockSpec((None, 1, OUT_DIM), lambda b: (b, 0, 0)),
        compiler_params=pltpu.CompilerParams(
            dimension_semantics=("parallel",),
            vmem_limit_bytes=32 * 1024 * 1024),
    )(params["conv_w"], x, x_ds, params["emb_w"], emb_b, params["masks"],
      params["lin_w"], lin_b)

    return out.reshape(B, OUT_DIM)


def reference_forward(x, params):
    """Pure-JAX reference mirroring the PyTorch forward semantics."""
    B = x.shape[0]
    pooled = jnp.mean(x[:, :3, :, :], axis=(2, 3))
    gx = pooled @ params["emb_w"] + params["emb_b"].reshape(1, EMBED)
    emb = jnp.zeros((B, EMBED), jnp.float32)
    for c in range(N_COND):
        m = jax.nn.relu(params["masks"][c])
        me = gx * m[None, :]
        n = jnp.sqrt(jnp.sum(me * me, axis=1, keepdims=True)) + EPS
        emb = emb + me / n
    scale = params["conv_w"][0] * params["conv_w"][1] * params["conv_w"][2] * params["conv_w"][3]
    xs = x[:, 3, ::STRIDE, ::STRIDE].reshape(B, DS_FEAT)
    z = (xs * scale) @ params["lin_w"] + params["lin_b"].reshape(1, DS_OUT)
    n = jnp.sqrt(jnp.sum(z * z, axis=1, keepdims=True)) + EPS
    return jnp.concatenate([emb, z / n], axis=1)


if __name__ == "__main__":
    key = jax.random.PRNGKey(0)
    ks = jax.random.split(key, 7)
    B = 2
    x = jax.random.normal(ks[0], (B, 4, H, W), jnp.float32)

    params = {
        # embeddingnet stand-in: Linear(3 -> EMBED) on globally-pooled RGB
        "emb_w": 0.1 * jax.random.normal(ks[1], (3, EMBED), jnp.float32),
        "emb_b": 0.1 * jax.random.normal(ks[2], (EMBED,), jnp.float32),
        # masks.weight.data.normal_(0.9, 0.7)  (learnedmask=True, prein=False)
        "masks": 0.9 + 0.7 * jax.random.normal(ks[3], (N_COND, EMBED), jnp.float32),
        # four Conv2d(1,1,k=1,s=2,bias=False) scalar weights
        "conv_w": jax.random.normal(ks[4], (4,), jnp.float32),
        # Linear(576, 128): stored as [in, out] (transpose of torch's weight)
        "lin_w": 0.05 * jax.random.normal(ks[5], (DS_FEAT, DS_OUT), jnp.float32),
        "lin_b": 0.05 * jax.random.normal(ks[6], (1, DS_OUT), jnp.float32),
    }

    out = jax.jit(conditional_simnet_forward)(x, params)
    jax.block_until_ready(out)

    ref = reference_forward(x, params)
    assert out.shape == (B, OUT_DIM), out.shape
    max_err = float(jnp.max(jnp.abs(out - ref)))
    assert jnp.allclose(out, ref, atol=1e-4, rtol=1e-4), max_err
    print("KERNEL_OK")
</pallas_src>

<mosaic_0001>
module attributes {stable_mosaic.version = 11 : i64} {
  func.func @_fused_kernel(%arg0: i32, %arg1: memref<4xf32, #tpu.memory_space<smem>>, %arg2: memref<1x3x384x384xf32, #tpu.memory_space<vmem>>, %arg3: memref<1x1x576xf32, #tpu.memory_space<vmem>>, %arg4: memref<3x32xf32, #tpu.memory_space<vmem>>, %arg5: memref<1x32xf32, #tpu.memory_space<vmem>>, %arg6: memref<4x32xf32, #tpu.memory_space<vmem>>, %arg7: memref<576x128xf32, #tpu.memory_space<vmem>>, %arg8: memref<1x128xf32, #tpu.memory_space<vmem>>, %arg9: memref<1x1x160xf32, #tpu.memory_space<vmem>>) attributes {dimension_semantics = [#tpu.dimension_semantics<parallel>], iteration_bounds = array<i64: 2>, scalar_prefetch = 0 : i64, scratch_operands = 0 : i64, tpu.core_type = #tpu.core_type<tc>, window_params = [{transform_indices = @transform_0, window_bounds = array<i64: 4>}, {transform_indices = @transform_1, window_bounds = array<i64: 1, 3, 384, 384>}, {transform_indices = @transform_2, window_bounds = array<i64: 1, 1, 576>}, {pipeline_mode = #tpu.pipeline_mode<synchronous>, transform_indices = @transform_3, window_bounds = array<i64: 3, 32>}, {pipeline_mode = #tpu.pipeline_mode<synchronous>, transform_indices = @transform_4, window_bounds = array<i64: 1, 32>}, {pipeline_mode = #tpu.pipeline_mode<synchronous>, transform_indices = @transform_5, window_bounds = array<i64: 4, 32>}, {pipeline_mode = #tpu.pipeline_mode<synchronous>, transform_indices = @transform_6, window_bounds = array<i64: 576, 128>}, {pipeline_mode = #tpu.pipeline_mode<synchronous>, transform_indices = @transform_7, window_bounds = array<i64: 1, 128>}, {transform_indices = @transform_8, window_bounds = array<i64: 1, 1, 160>}]} {
    %c0 = arith.constant 0 : index
    %c0_0 = arith.constant 0 : index
    %c0_1 = arith.constant 0 : index
    %c0_2 = arith.constant 0 : index
    %0 = vector.load %arg2[%c0, %c0_0, %c0_1, %c0_2] : memref<1x3x384x384xf32, #tpu.memory_space<vmem>>, vector<1x1x384x384xf32>
    %1 = vector.shape_cast %0 : vector<1x1x384x384xf32> to vector<384x384xf32>
    %cst = arith.constant dense<0.000000e+00> : vector<384xf32>
    %2 = vector.multi_reduction <add>, %1, %cst [0] : vector<384x384xf32> to vector<384xf32>
    %3 = vector.shape_cast %2 : vector<384xf32> to vector<1x384xf32>
    %c0_3 = arith.constant 0 : index
    %c1 = arith.constant 1 : index
    %c0_4 = arith.constant 0 : index
    %c0_5 = arith.constant 0 : index
    %4 = vector.load %arg2[%c0_3, %c1, %c0_4, %c0_5] : memref<1x3x384x384xf32, #tpu.memory_space<vmem>>, vector<1x1x384x384xf32>
    %5 = vector.shape_cast %4 : vector<1x1x384x384xf32> to vector<384x384xf32>
    %cst_6 = arith.constant dense<0.000000e+00> : vector<384xf32>
    %6 = vector.multi_reduction <add>, %5, %cst_6 [0] : vector<384x384xf32> to vector<384xf32>
    %7 = vector.shape_cast %6 : vector<384xf32> to vector<1x384xf32>
    %c0_7 = arith.constant 0 : index
    %c2 = arith.constant 2 : index
    %c0_8 = arith.constant 0 : index
    %c0_9 = arith.constant 0 : index
    %8 = vector.load %arg2[%c0_7, %c2, %c0_8, %c0_9] : memref<1x3x384x384xf32, #tpu.memory_space<vmem>>, vector<1x1x384x384xf32>
    %9 = vector.shape_cast %8 : vector<1x1x384x384xf32> to vector<384x384xf32>
    %cst_10 = arith.constant dense<0.000000e+00> : vector<384xf32>
    %10 = vector.multi_reduction <add>, %9, %cst_10 [0] : vector<384x384xf32> to vector<384xf32>
    %11 = vector.shape_cast %10 : vector<384xf32> to vector<1x384xf32>
    %12 = tpu.concatenate %3, %7, %11 in 0 : vector<1x384xf32>, vector<1x384xf32>, vector<1x384xf32> -> vector<3x384xf32>
    %cst_11 = arith.constant dense<0.000000e+00> : vector<3xf32>
    %13 = vector.multi_reduction <add>, %12, %cst_11 [1] : vector<3x384xf32> to vector<3xf32>
    %14 = vector.shape_cast %13 : vector<3xf32> to vector<3x1xf32>
    %cst_12 = arith.constant 6.78168407E-6 : f32
    %15 = vector.broadcast %cst_12 : f32 to vector<3x1xf32>
    %16 = arith.mulf %14, %15 : vector<3x1xf32>
    %c0_13 = arith.constant 0 : index
    %c0_14 = arith.constant 0 : index
    %17 = vector.load %arg4[%c0_13, %c0_14] : memref<3x32xf32, #tpu.memory_space<vmem>>, vector<3x32xf32>
    %18 = vector.broadcast %16 : vector<3x1xf32> to vector<3x32xf32>
    %19 = arith.mulf %18, %17 : vector<3x32xf32>
    %cst_15 = arith.constant dense<0.000000e+00> : vector<32xf32>
    %20 = vector.multi_reduction <add>, %19, %cst_15 [0] : vector<3x32xf32> to vector<32xf32>
    %21 = vector.shape_cast %20 : vector<32xf32> to vector<1x32xf32>
    %c0_16 = arith.constant 0 : index
    %c0_17 = arith.constant 0 : index
    %22 = vector.load %arg5[%c0_16, %c0_17] : memref<1x32xf32, #tpu.memory_space<vmem>>, vector<1x32xf32>
    %23 = arith.addf %21, %22 : vector<1x32xf32>
    %c0_18 = arith.constant 0 : index
    %c0_19 = arith.constant 0 : index
    %24 = vector.load %arg6[%c0_18, %c0_19] : memref<4x32xf32, #tpu.memory_space<vmem>>, vector<4x32xf32>
    %cst_20 = arith.constant 0.000000e+00 : f32
    %25 = vector.broadcast %cst_20 : f32 to vector<4x32xf32>
    %26 = arith.maximumf %24, %25 : vector<4x32xf32>
    %27 = vector.broadcast %23 : vector<1x32xf32> to vector<4x32xf32>
    %28 = arith.mulf %27, %26 : vector<4x32xf32>
    %29 = arith.mulf %28, %28 : vector<4x32xf32>
    %cst_21 = arith.constant dense<0.000000e+00> : vector<4xf32>
    %30 = vector.multi_reduction <add>, %29, %cst_21 [1] : vector<4x32xf32> to vector<4xf32>
    %31 = vector.shape_cast %30 : vector<4xf32> to vector<4x1xf32>
    %32 = math.sqrt %31 : vector<4x1xf32>
    %cst_22 = arith.constant 1.000000e-10 : f32
    %33 = vector.broadcast %cst_22 : f32 to vector<4x1xf32>
    %34 = arith.addf %32, %33 : vector<4x1xf32>
    %35 = vector.broadcast %34 : vector<4x1xf32> to vector<4x32xf32>
    %36 = arith.divf %28, %35 : vector<4x32xf32>
    %cst_23 = arith.constant dense<0.000000e+00> : vector<32xf32>
    %37 = vector.multi_reduction <add>, %36, %cst_23 [0] : vector<4x32xf32> to vector<32xf32>
    %38 = vector.shape_cast %37 : vector<32xf32> to vector<1x32xf32>
    %c0_24 = arith.constant 0 : index
    %39 = memref.load %arg1[%c0_24] : memref<4xf32, #tpu.memory_space<smem>>
    %c1_25 = arith.constant 1 : index
    %40 = memref.load %arg1[%c1_25] : memref<4xf32, #tpu.memory_space<smem>>
    %41 = arith.mulf %39, %40 : f32
    %c2_26 = arith.constant 2 : index
    %42 = memref.load %arg1[%c2_26] : memref<4xf32, #tpu.memory_space<smem>>
    %43 = arith.mulf %41, %42 : f32
    %c3 = arith.constant 3 : index
    %44 = memref.load %arg1[%c3] : memref<4xf32, #tpu.memory_space<smem>>
    %45 = arith.mulf %43, %44 : f32
    %c0_27 = arith.constant 0 : index
    %c0_28 = arith.constant 0 : index
    %c0_29 = arith.constant 0 : index
    %46 = vector.load %arg3[%c0_27, %c0_28, %c0_29] : memref<1x1x576xf32, #tpu.memory_space<vmem>>, vector<1x1x576xf32>
    %47 = vector.shape_cast %46 : vector<1x1x576xf32> to vector<1x576xf32>
    %c0_30 = arith.constant 0 : index
    %c0_31 = arith.constant 0 : index
    %48 = vector.load %arg7[%c0_30, %c0_31] : memref<576x128xf32, #tpu.memory_space<vmem>>, vector<576x128xf32>
    %cst_32 = arith.constant dense<0.000000e+00> : vector<1x128xf32>
    %49 = tpu.matmul %47, %48, %cst_32 {dimension_numbers = #tpu.dot_dimension_numbers<[1], [0], [0], [1], [0, 0, 1, 1], [], []>} : vector<1x576xf32>, vector<576x128xf32>, vector<1x128xf32> -> vector<1x128xf32>
    %50 = vector.broadcast %45 : f32 to vector<1x128xf32>
    %51 = arith.mulf %49, %50 : vector<1x128xf32>
    %c0_33 = arith.constant 0 : index
    %c0_34 = arith.constant 0 : index
    %52 = vector.load %arg8[%c0_33, %c0_34] : memref<1x128xf32, #tpu.memory_space<vmem>>, vector<1x128xf32>
    %53 = arith.addf %51, %52 : vector<1x128xf32>
    %54 = arith.mulf %53, %53 : vector<1x128xf32>
    %cst_35 = arith.constant dense<0.000000e+00> : vector<1xf32>
    %55 = vector.multi_reduction <add>, %54, %cst_35 [1] : vector<1x128xf32> to vector<1xf32>
    %56 = vector.shape_cast %55 : vector<1xf32> to vector<1x1xf32>
    %57 = math.sqrt %56 : vector<1x1xf32>
    %cst_36 = arith.constant 1.000000e-10 : f32
    %58 = vector.broadcast %cst_36 : f32 to vector<1x1xf32>
    %59 = arith.addf %57, %58 : vector<1x1xf32>
    %60 = vector.broadcast %59 : vector<1x1xf32> to vector<1x128xf32>
    %61 = arith.divf %53, %60 : vector<1x128xf32>
    %62 = tpu.concatenate %38, %61 in 1 : vector<1x32xf32>, vector<1x128xf32> -> vector<1x160xf32>
    %c0_37 = arith.constant 0 : index
    %c0_38 = arith.constant 0 : index
    %c0_39 = arith.constant 0 : index
    %63 = vector.load %arg9[%c0_37, %c0_38, %c0_39] : memref<1x1x160xf32, #tpu.memory_space<vmem>>, vector<1x1x160xf32>
    %64 = vector.shape_cast %63 : vector<1x1x160xf32> to vector<1x160xf32>
    %65 = vector.shape_cast %62 : vector<1x160xf32> to vector<1x1x160xf32>
    tpu.vector_store %arg9[%c0_37, %c0_38, %c0_39], %65 {strides = array<i32>} : memref<1x1x160xf32, #tpu.memory_space<vmem>>, vector<1x1x160xf32>,
    return
  }
  func.func @transform_0(%arg0: i32) -> i32 {
    %c0_i32 = arith.constant 0 : i32
    %c0_i32_0 = arith.constant 0 : i32
    return %c0_i32 : i32
  }
  func.func @transform_1(%arg0: i32) -> (i32, i32, i32, i32) {
    %c0_i32 = arith.constant 0 : i32
    %c0_i32_0 = arith.constant 0 : i32
    %c0_i32_1 = arith.constant 0 : i32
    %c0_i32_2 = arith.constant 0 : i32
    return %arg0, %c0_i32, %c0_i32_0, %c0_i32_1 : i32, i32, i32, i32
  }
  func.func @transform_2(%arg0: i32) -> (i32, i32, i32) {
    %c0_i32 = arith.constant 0 : i32
    %c0_i32_0 = arith.constant 0 : i32
    %c0_i32_1 = arith.constant 0 : i32
    return %arg0, %c0_i32, %c0_i32_0 : i32, i32, i32
  }
  func.func @transform_3(%arg0: i32) -> (i32, i32) {
    %c0_i32 = arith.constant 0 : i32
    %c0_i32_0 = arith.constant 0 : i32
    %c0_i32_1 = arith.constant 0 : i32
    return %c0_i32, %c0_i32_0 : i32, i32
  }
  func.func @transform_4(%arg0: i32) -> (i32, i32) {
    %c0_i32 = arith.constant 0 : i32
    %c0_i32_0 = arith.constant 0 : i32
    %c0_i32_1 = arith.constant 0 : i32
    return %c0_i32, %c0_i32_0 : i32, i32
  }
  func.func @transform_5(%arg0: i32) -> (i32, i32) {
    %c0_i32 = arith.constant 0 : i32
    %c0_i32_0 = arith.constant 0 : i32
    %c0_i32_1 = arith.constant 0 : i32
    return %c0_i32, %c0_i32_0 : i32, i32
  }
  func.func @transform_6(%arg0: i32) -> (i32, i32) {
    %c0_i32 = arith.constant 0 : i32
    %c0_i32_0 = arith.constant 0 : i32
    %c0_i32_1 = arith.constant 0 : i32
    return %c0_i32, %c0_i32_0 : i32, i32
  }
  func.func @transform_7(%arg0: i32) -> (i32, i32) {
    %c0_i32 = arith.constant 0 : i32
    %c0_i32_0 = arith.constant 0 : i32
    %c0_i32_1 = arith.constant 0 : i32
    return %c0_i32, %c0_i32_0 : i32, i32
  }
  func.func @transform_8(%arg0: i32) -> (i32, i32, i32) {
    %c0_i32 = arith.constant 0 : i32
    %c0_i32_0 = arith.constant 0 : i32
    %c0_i32_1 = arith.constant 0 : i32
    return %arg0, %c0_i32, %c0_i32_0 : i32, i32, i32
  }
}

</mosaic_0001>

<bundles_post_ra>
// kernel: squeeze.1
= control target key start
LH: loop header
LB: loop body
LE: loop exit
PB: predicated region body
PF: predicated region fallthrough
CT: control target
= control target key end

     0   :  { %vm32_vm0 = vcmask 130048   ;;  %s41_s6 = smov 3  ;;  %s44_s7 = smov 3  ;;  %vm18_vm1 = vcmask 1043458   ;;  %vm28_vm2 = vcmask 64512   ;;  %vm4_vm3 = vcmask 195584   ;;  %s462_s0 = inlined_call_operand.vmem [shape: f32[2,1,24,24], index: 0, kind: input, shape index: {}]   ;;  %s463_s1 = inlined_call_operand.vmem [shape: f32[2,1,576], index: 1, kind: output, shape index: {}]  }
   0x1   :  { %v268_v0 = vld [vmem:[%s462_s0 + $0xa] ss:$24 sm:%s41_s6]   ;;  %s57_s12 = smov 3  ;;  %s13_s15 = smov 3  ;;  %vm61_vm4 = vcmask 1048384   ;;  %vm36_vm5 = vcmask 1048512  }
   0x2   :  { %v269_v1 = vld [vmem:[%s462_s0 + $0xa] ss:$24 sm:%s44_s7]   ;;  %v270_v3 = vld [vmem:[%s462_s0 + $0xf] ss:$24 sm:%s57_s12]   ;;  %s313_s16 = smov 112   ;;  %s314_s17 = smov 104  }
   0x3   :  { %v47_v2 = vsel %vm32_vm0, %v269_v1, %v268_v0  ;;  %59 = vrot.lane.b32.xlu1 %v270_v3, %s314_s17  ;;  %v264_v4 = vld [vmem:[%s462_s0 + $0x15] ss:$-16 sm:%s13_s15]   ;;  %s16_s20 = smov 12  ;;  %s21_s21 = smov 3  ;;  %vm53_vm6 = vcmask 1048448   ;;  %vm74_vm7 = vcmask 982784  }
   0x4   :  { %48 = vrot.lane.b32.xlu0 %v47_v2, %s313_s16  ;;  %v265_v5 = vld [vmem:[%s462_s0 - $0x3] ss:$16 sm:%s16_s20]   ;;  %s24_s26 = smov 12  ;;  %s65_s29 = smov 3  ;;  %vm83_vm8 = vcmask 917184   ;;  %vm91_vm9 = vcmask 851584  }
   0x5   :  { %v266_v6 = vld [vmem:[%s462_s0 + $0x5] ss:$24 sm:%s21_s21]   ;;  %v19_v7 = vsel %vm18_vm1, %v265_v5, %v264_v4  ;;  %s68_s30 = smov 12  ;;  %v271_v10 = vld [vmem:[%s462_s0 + $0x4] ss:$24 sm:%s65_s29]   ;;  %s79_s6 = smov 3 }
   0x6   :  { %v267_v8 = vld [vmem:[%s462_s0 - $0x1b] ss:$24 sm:%s24_s26]   ;;  %v272_v11 = vld [vmem:[%s462_s0 - $0x1c] ss:$24 sm:%s68_s30]   ;;  %s87_s7 = smov 3  ;;  %s315_s8 = smov 120  }
   0x7   :  { %v27_v9 = vsel %vm18_vm1, %v267_v8, %v266_v6  ;;  %v71_v13 = vsel %vm18_vm1, %v272_v11, %v271_v10  ;;  %s316_s9 = smov 96   ;;  %s95_s10 = smov 3  ;;  %v273_v14 = vld [vmem:[%s462_s0 + $0x9] ss:$24 sm:%s79_s6]   ;;  %v274_v15 = vld [vmem:[%s462_s0 + $0xe] ss:$24 sm:%s87_s7]  }
   0x8   :  { %v29_v12 = vsel %vm28_vm2, %v27_v9, %v19_v7  ;;  %72 = vrot.lane.b32.xlu1 %v71_v13, %s316_s9  ;;  %s98_s15 = smov 12  ;;  %v275_v16 = vld [vmem:[%s462_s0 + $0x3] ss:$24 sm:%s95_s10]   ;;  %s109_s20 = smov 3  ;;  %vm104_vm10 = vcmask 785984   ;;  %vm113_vm11 = vcmask 720384  }
   0x9   :  { %30 = vrot.lane.b32.xlu0 %v29_v12, %s315_s8  ;;  %v276_v17 = vld [vmem:[%s462_s0 - $0x1d] ss:$24 sm:%s98_s15]   ;;  %s317_s21 = smov 88   ;;  %s318_s22 = smov 80   ;;  %vm121_vm12 = vcmask 654784   ;;  %vm134_vm13 = vcmask 589184  }
   0xa   :  { %s125_s23 = smov 3  ;;  %s128_s24 = smov 12  ;;  %v101_v18 = vsel %vm18_vm1, %v276_v17, %v275_v16  ;;  %v277_v19 = vld [vmem:[%s462_s0 + $0x8] ss:$24 sm:%s109_s20]   ;;  %vm148_vm14 = vcmask 523584   ;;  %vm157_vm15 = vcmask 457984  }
   0xb   :  { %s117_s27 = smov 3  ;;  %v279_v20 = vld [vmem:[%s462_s0 + $0x2] ss:$24 sm:%s125_s23]   ;;  %s139_s3 = smov 3 }
   0xc   :  { %89 = vrot.lane.b32.xlu1 %v274_v15, %s318_s22  ;;  %v280_v21 = vld [vmem:[%s462_s0 - $0x1e] ss:$24 sm:%s128_s24]   ;;  %s142_s4 = smov 12  ;;  %s319_s5 = smov 72  }
   0xd   :  { %81 = vrot.lane.b32.xlu0 %v273_v14, %s317_s21  ;;  %s320_s6 = smov 64   ;;  %s153_s7 = smov 3  ;;  %v278_v22 = vld [vmem:[%s462_s0 + $0xd] ss:$24 sm:%s117_s27]   ;;  %v131_v23 = vsel %vm18_vm1, %v280_v21, %v279_v20 }
   0xe   :  { %s161_s10 = smov 3  ;;  %s164_s11 = smov 12  ;;  %v281_v24 = vld [vmem:[%s462_s0 + $0x17] ss:$-16 sm:%s139_s3]   ;;  %v282_v25 = vld [vmem:[%s462_s0 - $0x1] ss:$16 sm:%s142_s4]  }
   0xf   :  { %v283_v26 = vld [vmem:[%s462_s0 + $0xc] ss:$24 sm:%s153_s7]   ;;  %s175_s18 = smov 3  ;;  %s178_s19 = smov 12  ;;  %v284_v27 = vld [vmem:[%s462_s0 + $0x1] ss:$24 sm:%s161_s10]   ;;  %v145_v29 = vsel %vm18_vm1, %v282_v25, %v281_v24 }
  0x10   :  { %111 = vrot.lane.b32.xlu1 %v277_v19, %s320_s6  ;;  %s321_s20 = smov 56   ;;  %s322_s21 = smov 48   ;;  %v285_v28 = vld [vmem:[%s462_s0 - $0x1f] ss:$24 sm:%s164_s11]  }
  0x11   :  { %102 = vrot.lane.b32.xlu0 %v101_v18, %s319_s5  ;;  %s2_s26 = smov 3  ;;  %s7_s27 = smov 3  ;;  %v286_v32 = vld [vmem:[%s462_s0 + $0x16] ss:$-16 sm:%s175_s18]   ;;  %v167_v34 = vsel %vm18_vm1, %v285_v28, %v284_v27 }
  0x12   :  { %v3_v30 = vld [vmem:[%s462_s0] ss:$16 sm:%s2_s26]   ;;  %v263_v31 = vld [vmem:[%s462_s0 + $0x18] ss:$16 sm:%s7_s27]   ;;  %s323_s7 = smov 40   ;;  %s324_s8 = smov 32  }
  0x13   :  { %v287_v33 = vld [vmem:[%s462_s0 - $0x2] ss:$16 sm:%s178_s19]   ;;  %5 = vst.msk [vmem:[#allocation0] ss:$24 sm:$0x3] %vm4_vm3, %v3_v30   ;;  %s189_s9 = smov 3 }
  0x14   :  { %132 = vrot.lane.b32.xlu1 %v131_v23, %s322_s21  ;;  %11 = vst.msk [vmem:[#allocation0 + $0x28] ss:$24 sm:$0x3] %vm4_vm3, %v263_v31   ;;  %v181_v35 = vsel %vm18_vm1, %v287_v33, %v286_v32  ;;  %s325_s10 = smov 24   ;;  %s326_s11 = smov 16   ;;  %vm184_vm1 = vcmask 326784  }
  0x15   :  { %119 = vrot.lane.b32.xlu0 %v278_v22, %s321_s20  ;;  %v288_v36 = vld [vmem:[%s462_s0 + $0xb] ss:$24 sm:%s189_s9]   ;;  %s327_s0 = smov 8  }
  0x18   :  { %155 = vrot.lane.b32.xlu1 %v283_v26, %s324_s8 }
  0x19   :  { %146 = vrot.lane.b32.xlu0 %v145_v29, %s323_s7 }
  0x1c   :  { %182 = vrot.lane.b32.xlu1 %v181_v35, %s326_s11 }
  0x1d   :  { %168 = vrot.lane.b32.xlu0 %v167_v34, %s325_s10 }
  0x21   :  { %191 = vrot.lane.b32.xlu0 %v288_v36, %s327_s0 }
  0x75   :  { %v60_v38 = vpop.permute.xlu1 %59  }
  0x76   :  { %v49_v37 = vpop.permute.xlu0 %48  }
  0x77   :  { %52 = vst.msk [vmem:[#allocation0 + $0x10] ss:$40 sm:$0x3] %vm28_vm2, %v49_v37   ;;  %vm193_vm2 = vcmask 261184  }
  0x78   :  { %63 = vst.msk [vmem:[#allocation0 + $0x10] ss:$40 sm:$0x3] %vm61_vm4, %v60_v38  }
  0x7a   :  { %v73_v40 = vpop.permute.xlu1 %72  }
  0x7b   :  { %v31_v39 = vpop.permute.xlu0 %30  }
  0x7c   :  { %34 = vst.msk [vmem:[#allocation0 + $0x20] ss:$-24 sm:$0x3] %vm32_vm0, %v31_v39   ;;  %35 = vst.msk [vmem:[#allocation0] ss:$24 sm:$0xc] %vm32_vm0, %v31_v39  }
  0x7d   :  { %37 = vst.msk [vmem:[#allocation0] ss:$40 sm:$0x3] %vm36_vm5, %v31_v39   ;;  %39 = vst.msk [vmem:[#allocation0 - $0x38] ss:$40 sm:$0xc] %vm36_vm5, %v31_v39  }
  0x7e   :  { %75 = vst.msk [vmem:[#allocation0] ss:$40 sm:$0x3] %vm74_vm7, %v73_v40   ;;  %77 = vst.msk [vmem:[#allocation0 - $0x38] ss:$40 sm:$0xc] %vm74_vm7, %v73_v40   ;;  %v90_v42 = vpop.permute.xlu1 %89  }
  0x7f   :  { %55 = vst.msk [vmem:[#allocation0 + $0x8] ss:$40 sm:$0x3] %vm53_vm6, %v49_v37   ;;  %v82_v41 = vpop.permute.xlu0 %81   ;;  %vm170_vm0 = vcmask 392384  }
  0x80   :  { %85 = vst.msk [vmem:[#allocation0 + $0x8] ss:$40 sm:$0x3] %vm83_vm8, %v82_v41  }
  0x81   :  { %93 = vst.msk [vmem:[#allocation0 + $0x10] ss:$40 sm:$0x3] %vm91_vm9, %v90_v42  }
  0x82   :  { %v112_v44 = vpop.permute.xlu1 %111  }
  0x83   :  { %v103_v43 = vpop.permute.xlu0 %102   ;;  %115 = vst.msk [vmem:[#allocation0 + $0x8] ss:$40 sm:$0x3] %vm113_vm11, %v112_v44  }
  0x84   :  { %105 = vst.msk [vmem:[#allocation0] ss:$40 sm:$0x3] %vm104_vm10, %v103_v43   ;;  %107 = vst.msk [vmem:[#allocation0 - $0x38] ss:$40 sm:$0xc] %vm104_vm10, %v103_v43  }
  0x86   :  { %v133_v46 = vpop.permute.xlu1 %132  }
  0x87   :  { %v120_v45 = vpop.permute.xlu0 %119   ;;  %135 = vst.msk [vmem:[#allocation0] ss:$40 sm:$0x3] %vm134_vm13, %v133_v46   ;;  %137 = vst.msk [vmem:[#allocation0 - $0x38] ss:$40 sm:$0xc] %vm134_vm13, %v133_v46  }
  0x88   :  { %123 = vst.msk [vmem:[#allocation0 + $0x10] ss:$40 sm:$0x3] %vm121_vm12, %v120_v45  }
  0x8a   :  { %v156_v48 = vpop.permute.xlu1 %155  }
  0x8b   :  { %v147_v47 = vpop.permute.xlu0 %146   ;;  %159 = vst.msk [vmem:[#allocation0 + $0x10] ss:$40 sm:$0x3] %vm157_vm15, %v156_v48  }
  0x8c   :  { %150 = vst.msk [vmem:[#allocation0 + $0x20] ss:$-24 sm:$0x3] %vm148_vm14, %v147_v47   ;;  %151 = vst.msk [vmem:[#allocation0] ss:$24 sm:$0xc] %vm148_vm14, %v147_v47  }
  0x8e   :  { %v183_v50 = vpop.permute.xlu1 %182  }
  0x8f   :  { %v169_v49 = vpop.permute.xlu0 %168   ;;  %186 = vst.msk [vmem:[#allocation0 + $0x20] ss:$-24 sm:$0x3] %vm184_vm1, %v183_v50   ;;  %187 = vst.msk [vmem:[#allocation0] ss:$24 sm:$0xc] %vm184_vm1, %v183_v50  }
  0x90   :  { %171 = vst.msk [vmem:[#allocation0] ss:$40 sm:$0x3] %vm170_vm0, %v169_v49   ;;  %173 = vst.msk [vmem:[#allocation0 - $0x38] ss:$40 sm:$0xc] %vm170_vm0, %v169_v49  }
  0x93   :  { %v192_v51 = vpop.permute.xlu0 %191  }
  0x94   :  { %195 = vst.msk [vmem:[#allocation0 + $0x10] ss:$40 sm:$0x3] %vm193_vm2, %v192_v51  }
  0x96   :  { %v203_v56 = vld [vmem:[#allocation0 + $0x8] sm:$0x1]  ;;  %v220_v57 = vld [vmem:[#allocation0 + $0x20] sm:$0x1]  ;;  %v232_v58 = vld [vmem:[#allocation0 + $0x30] sm:$0x1] }
  0x97   :  { %v199_v52 = vld [vmem:[#allocation0] sm:$0x1]  ;;  %v214_v53 = vld [vmem:[#allocation0 + $0x18] sm:$0x1]  ;;  %v226_v54 = vld [vmem:[#allocation0 + $0x28] sm:$0x1] }
  0x98   :  { %201 = vst [vmem:[%s463_s1] sm:$0x1] %v199_v52  ;;  %291 = vst [vmem:[%s463_s1 + $0x3] sm:$0x1] %v214_v53  ;;  %v244_v55 = vld [vmem:[#allocation0 + $0x40] sm:$0x1] }
  0x99   :  { %293 = vst [vmem:[%s463_s1 + $0x5] sm:$0x1] %v226_v54  ;;  %296 = vst [vmem:[%s463_s1 + $0x8] sm:$0x1] %v244_v55  ;;  %v250_v59 = vld [vmem:[#allocation0 + $0x48] sm:$0x1] }
  0x9a   :  { %289 = vst [vmem:[%s463_s1 + $0x1] sm:$0x1] %v203_v56  ;;  %292 = vst [vmem:[%s463_s1 + $0x4] sm:$0x1] %v220_v57 }
  0x9b   :  { %294 = vst [vmem:[%s463_s1 + $0x6] sm:$0x1] %v232_v58  ;;  %297 = vst [vmem:[%s463_s1 + $0x9] sm:$0x1] %v250_v59  ;;  %v208_v60 = vld [vmem:[#allocation0 + $0x10] sm:$0x1] }
  0x9c   :  { %v238_v61 = vld [vmem:[#allocation0 + $0x38] sm:$0x1]  ;;  %290 = vst [vmem:[%s463_s1 + $0x2] sm:$0x1] %v208_v60 }
  0x9d   :  { %295 = vst [vmem:[%s463_s1 + $0x7] sm:$0x1] %v238_v61 }

// kernel: conditional_simnet_forward.1
= control target key start
LH: loop header
LB: loop body
LE: loop exit
PB: predicated region body
PF: predicated region fallthrough
CT: control target
= control target key end

     0   :  { %13 = vsyncpa [#allocation4], 0  ;;  %s3542_s0 = inlined_call_operand.hbm [shape: f32[4], index: 0, kind: input, shape index: {}]   ;;  %s3543_s1 = inlined_call_operand.hbm [shape: f32[2,4,384,384], index: 1, kind: input, shape index: {}]   ;;  %s3544_s2 = inlined_call_operand.vmem [shape: f32[2,1,576], index: 2, kind: input, shape index: {}]   ;;  %s3545_s3 = inlined_call_operand.hbm [shape: f32[3,32], index: 3, kind: input, shape index: {}]   ;;  %s3546_s4 = inlined_call_operand.hbm [shape: f32[1,32], index: 4, kind: input, shape index: {}]   ;;  %s3547_s5 = inlined_call_operand.hbm [shape: f32[4,32], index: 5, kind: input, shape index: {}]   ;;  %s3548_s6 = inlined_call_operand.hbm [shape: f32[576,128], index: 6, kind: input, shape index: {}]   ;;  %s3549_s7 = inlined_call_operand.hbm [shape: f32[1,128], index: 7, kind: input, shape index: {}]   ;;  %s3550_s8 = inlined_call_operand.vmem [shape: f32[2,1,160], index: 8, kind: output, shape index: {}]  }
   0x1   :  { %14 = vsyncpa [#allocation3], 0 }
   0x2   :  { %16 = vsyncpa [#allocation3 + $0x1], 0 }
   0x3   :  { %17 = vsyncpa [#allocation7], 0 }
   0x4   :  { %18 = vsyncpa [#allocation10], 0 }
   0x5   :  { %19 = vsyncpa [#allocation13], 0  ;;  %s2791_s27 = smov 0   ;;  %s2793_s28 = smov 0  }
   0x6   :  { %s2795_s29 = smov 0   ;;  %s2797_s30 = smov 0  }
   0x7 LB: > { %s2730_s9 = smov [#allocation6]   ;;  %s2812_s11 = sadd.s32 4294967295, %s2728_s30   ;;  %s2728_s30 = sphi %s2797_s30, %s3571_s30   ;;  %s2724_s29 = sphi %s2795_s29, %s3570_s29   ;;  %s2720_s28 = sphi %s2793_s28, %s3569_s28   ;;  %s2716_s27 = sphi %s2791_s27, %s3568_s27  }
   0x8   : > { %s256_s10 = sshll.u32 %s2730_s9, 4  ;;  %p1889_p0 = scmp.ge.s32.totalorder %s2728_s30, 1  ;;  %s2817_s10 = int_to_ptr.vmem [resolvable:$true] %s256_s10 }
   0x9   : > { %p3551_p1 = scmp.eq.s32.totalorder %s2812_s11, 0  ;;  %p234_p2 = scmp.lt.s32.totalorder %s2728_s30, 3 }
   0xa   : > { %s2731_s13 = smov [#allocation9]   ;;  %s2732_s16 = smov [#allocation8]  }
   0xb   : > { %p2819_p3 = pnand %p1889_p0, %p234_p2  ;;  %s278_s14 = sshll.u32 %s2731_s13, 4  ;;  %s2825_s14 = int_to_ptr.vmem [resolvable:$true] %s278_s14 }
   0xc   : > { %s267_s17 = sshll.u32 %s2732_s16, 4  ;;  %s2733_s18 = smov [#allocation11]   ;;  %s2833_s17 = int_to_ptr.vmem [resolvable:$true] %s267_s17 }
   0xd   : > { %s3553_s12 = scalar_select %p2819_p3, 1, 0 }
   0xe   : > { %p2404_p4 = pneg %p2819_p3  ;;  %s2835_s19 = sshll.u32 %s2733_s18, 4  ;;  %s289_s19 = int_to_ptr.vmem [resolvable:$true] %s2835_s19 }
   0xf   : > { %s2495_s22 = scalar_lea.hbm %s3545_s3, 64 }
  0x10   : > { %p2829_p5 = pnand %p2404_p4, %p3551_p1  ;;  %p2496_p6 = scmp.ne.s32.totalorder %s3545_s3, %s2495_s22 }
  0x11   : > { %p2502_p10 = scmp.lt.u32.totalorder %s2495_s22, %s3545_s3 }
  0x12   : > { %p2845_p7 = pneg %p2829_p5 }
  0x14   : > { %p2498_p8 = pnand %p2845_p7, %p2496_p6 }
  0x16   : > { %p2499_p9 = pneg %p2498_p8 }
  0x18   : > { %p2504_p11 = pnand %p2502_p10, %p2499_p9 }
  0x1a   : > { %2507 = shalt.err (!%p2504_p11)
}
  0x1b   : > { %s2508_s13 = scalar_lea.vmem %s2817_s10, 64  ;;  %p2516_p2 = scmp.lt.s32.totalorder %s2817_s10, %s2817_s10 }
  0x1c   : > { %p2509_p12 = scmp.ne.s32.totalorder %s2817_s10, %s2508_s13  ;;  %p2517_p4 = scmp.lt.s32.totalorder %s2508_s13, %s2508_s13 }
  0x1e   : > { %p2511_p13 = pnand %p2509_p12, %p2845_p7  ;;  %p2518_p6 = por %p2517_p4, %p2516_p2 }
  0x20   : > { %p2512_p0 = pneg %p2511_p13 }
  0x22   : > { %p2519_p8 = pnand %p2518_p6, %p2512_p0 }
  0x24   : > { %2522 = shalt.err (!%p2519_p8)
}
  0x25   : > { %2410 = dma.hbm_to_vmem [thread:$0]  (!%p2829_p5), %s3545_s3, 64, %s2817_s10, [#allocation7]  }
  0x26   : > { %s2523_s22 = scalar_lea.hbm %s3547_s5, 64 }
  0x27   : > { %p2524_p9 = scmp.ne.s32.totalorder %s3547_s5, %s2523_s22  ;;  %p2530_p12 = scmp.lt.u32.totalorder %s2523_s22, %s3547_s5 }
  0x29   : > { %p2526_p10 = pnand %p2524_p9, %p2845_p7 }
  0x2b   : > { %p2527_p11 = pneg %p2526_p10 }
  0x2d   : > { %p2532_p13 = pnand %p2530_p12, %p2527_p11 }
  0x2f   : > { %2535 = shalt.err (!%p2532_p13)
}
  0x30   : > { %s2536_s10 = scalar_lea.vmem %s2825_s14, 64  ;;  %p2544_p6 = scmp.lt.s32.totalorder %s2825_s14, %s2825_s14 }
  0x31   : > { %p2537_p0 = scmp.ne.s32.totalorder %s2825_s14, %s2536_s10  ;;  %p2545_p8 = scmp.lt.s32.totalorder %s2536_s10, %s2536_s10 }
  0x33   : > { %p2539_p2 = pnand %p2537_p0, %p2845_p7  ;;  %p2546_p9 = por %p2545_p8, %p2544_p6 }
  0x35   : > { %p2540_p4 = pneg %p2539_p2 }
  0x37   : > { %p2547_p10 = pnand %p2546_p9, %p2540_p4 }
  0x39   : > { %2550 = shalt.err (!%p2547_p10)
}
  0x3a   : > { %2416 = dma.hbm_to_vmem [thread:$0]  (!%p2829_p5), %s3547_s5, 64, %s2825_s14, [#allocation10]  }
  0x3b   : > { %s2551_s21 = scalar_lea.hbm %s3542_s0, 16 }
  0x3c   : > { %p2552_p11 = scmp.ne.s32.totalorder %s3542_s0, %s2551_s21  ;;  %p2558_p0 = scmp.lt.u32.totalorder %s2551_s21, %s3542_s0 }
  0x3e   : > { %p2554_p12 = pnand %p2552_p11, %p2845_p7 }
  0x40   : > { %p2555_p13 = pneg %p2554_p12 }
  0x42   : > { %p2560_p2 = pnand %p2558_p0, %p2555_p13 }
  0x44   : > { %2563 = shalt.err (!%p2560_p2)
}
  0x45   : > { %s2734_s9 = smov [#allocation2]   ;;  %s2564_s18 = scalar_lea.hbm %s3546_s4, 16 }
  0x46   : > { %2407 = dma.hbm_to_smem (!%p2829_p5), %s3542_s0, 16, %s2734_s9, [#allocation4]  }
  0x47   : > { %p2565_p4 = scmp.ne.s32.totalorder %s3546_s4, %s2564_s18  ;;  %p2571_p9 = scmp.lt.u32.totalorder %s2564_s18, %s3546_s4 }
  0x49   : > { %p2567_p6 = pnand %p2565_p4, %p2845_p7 }
  0x4b   : > { %p2568_p8 = pneg %p2567_p6 }
  0x4d   : > { %p2573_p10 = pnand %p2571_p9, %p2568_p8 }
  0x4f   : > { %2576 = shalt.err (!%p2573_p10)
}
  0x50   : > { %s2577_s24 = scalar_lea.vmem %s2833_s17, 16  ;;  %s2584_s26 = scalar_lea.vmem %s2833_s17, 32 }
  0x51   : > { %p2578_p11 = scmp.ne.s32.totalorder %s2833_s17, %s2577_s24  ;;  %p2585_p0 = scmp.lt.s32.totalorder %s2833_s17, %s2833_s17 }
  0x52   : > { %p2586_p2 = scmp.lt.s32.totalorder %s2584_s26, %s2577_s24 }
  0x53   : > { %p2580_p12 = pnand %p2578_p11, %p2845_p7 }
  0x54   : > { %p2587_p4 = por %p2586_p2, %p2585_p0 }
  0x55   : > { %p2581_p13 = pneg %p2580_p12 }
  0x57   : > { %p2588_p6 = pnand %p2587_p4, %p2581_p13 }
  0x59   : > { %2591 = shalt.err (!%p2588_p6)
}
  0x5a   : > { %2413 = dma.hbm_to_vmem [thread:$0]  (!%p2829_p5), %s3546_s4, 16, %s2833_s17, [#allocation7]  }
  0x5b   : > { %s2592_s16 = scalar_lea.hbm %s3548_s6, 9216 }
  0x5c   : > { %p2593_p8 = scmp.ne.s32.totalorder %s3548_s6, %s2592_s16  ;;  %p2599_p11 = scmp.lt.u32.totalorder %s2592_s16, %s3548_s6 }
  0x5e   : > { %p2595_p9 = pnand %p2593_p8, %p2845_p7 }
  0x60   : > { %p2596_p10 = pneg %p2595_p9 }
  0x62   : > { %p2601_p12 = pnand %p2599_p11, %p2596_p10 }
  0x64   : > { %2604 = shalt.err (!%p2601_p12)
}
  0x65   : > { %s2605_s23 = scalar_lea.vmem %s289_s19, 9216  ;;  %p2613_p4 = scmp.lt.s32.totalorder %s289_s19, %s289_s19 }
  0x66   : > { %p2606_p13 = scmp.ne.s32.totalorder %s289_s19, %s2605_s23  ;;  %p2614_p6 = scmp.lt.s32.totalorder %s2605_s23, %s2605_s23 }
  0x68   : > { %p2608_p0 = pnand %p2606_p13, %p2845_p7  ;;  %p2615_p1 = por %p2614_p6, %p2613_p4 }
  0x6a   : > { %p2609_p2 = pneg %p2608_p0 }
  0x6c   : > { %p2616_p3 = pnand %p2615_p1, %p2609_p2 }
  0x6e   : > { %2619 = shalt.err (!%p2616_p3)
}
  0x6f   : > { %s2735_s17 = smov 128   ;;  %s2736_s24 = smov 8  }
  0x70   : > { %2419 = dma.hbm_to_vmem [thread:$0]  (!%p2829_p5), %s3548_s6, 9216, %s289_s19, [#allocation10], %s2735_s17, %s2735_s17, %s2736_s24  }
  0x71   : > { %s2737_s14 = smov [#allocation12]   ;;  %s2620_s18 = scalar_lea.hbm %s3549_s7, 16 }
  0x72   : > { %s302_s10 = sshll.u32 %s2737_s14, 4  ;;  %p2621_p1 = scmp.ne.s32.totalorder %s3549_s7, %s2620_s18  ;;  %s303_s10 = int_to_ptr.vmem [resolvable:$true] %s302_s10 }
  0x73   : > { %p2627_p9 = scmp.lt.u32.totalorder %s2620_s18, %s3549_s7 }
  0x74   : > { %p2623_p3 = pnand %p2621_p1, %p2845_p7 }
  0x76   : > { %p2624_p8 = pneg %p2623_p3 }
  0x78   : > { %p2629_p10 = pnand %p2627_p9, %p2624_p8 }
  0x7a   : > { %2632 = shalt.err (!%p2629_p10)
}
  0x7b   : > { %s2633_s19 = scalar_lea.vmem %s303_s10, 16  ;;  %s2640_s17 = scalar_lea.vmem %s303_s10, 32 }
  0x7c   : > { %p2634_p11 = scmp.ne.s32.totalorder %s303_s10, %s2633_s19  ;;  %p2641_p0 = scmp.lt.s32.totalorder %s303_s10, %s303_s10 }
  0x7d   : > { %p2642_p2 = scmp.lt.s32.totalorder %s2640_s17, %s2633_s19 }
  0x7e   : > { %p2636_p12 = pnand %p2634_p11, %p2845_p7 }
  0x7f   : > { %p2643_p4 = por %p2642_p2, %p2641_p0 }
  0x80   : > { %p2637_p13 = pneg %p2636_p12 }
  0x82   : > { %p2644_p6 = pnand %p2643_p4, %p2637_p13 }
  0x84   : > { %2647 = shalt.err (!%p2644_p6)
}
  0x85   : > { %2422 = dma.hbm_to_vmem [thread:$0]  (!%p2829_p5), %s3549_s7, 16, %s303_s10, [#allocation13]  }
  0x86   : > { %s2967_s25 = sadd.s32 1, %s2728_s30   ;;  %s53_s15 = sadd.s32 1, %s2724_s29 }
  0x87   : > { %s50_s9 = ssub.s32 %s2728_s30, %s2967_s25  ;;  %p60_p7 = scmp.ne.s32.totalorder %s2724_s29, %s2720_s28 }
  0x88   : > { %p51_p1 = scmp.eq.s32.totalorder %s50_s9, 0  ;;  %p61_p3 = scmp.eq.s32.totalorder %s2728_s30, 0 }
  0x89   : > { %p66_p8 = scmp.ne.s32.totalorder %s2720_s28, %s2716_s27  ;;  %p2433_p9 = scmp.lt.s32.totalorder %s2728_s30, 2 }
  0x8a   : > { %s2979_s14 = scalar_select %p51_p1, %s2724_s29, %s53_s15  }
  0x8b   : > { %p62_p10 = por %p61_p3, %p60_p7  ;;  %p3556_p11 = scmp.eq.s32.totalorder %s2812_s11, 0 }
  0x8c   : > { %s313_s16 = sand.u32 1, %s2724_s29   ;;  %s2375_s10 = smul.u32 73728, %s2728_s30 }
  0x8d   : > { %p2983_p12 = por %p3556_p11, %p66_p8  ;;  %s2374_s18 = smul.u32 3456, %s313_s16 }
  0x8e   : > { %s2992_s21 = scalar_lea.hbm %s3543_s1, %s2375_s10  ;;  %p2994_p5 = pnand %p2433_p9, %p62_p10 }
  0x8f   : > { %s317_s23 = scalar_lea.vmem [#allocation5], %s2374_s18  ;;  %s3000_s30 = scalar_lea.sflag [#allocation3], %s313_s16 }
  0x90   : > { %s324_s19 = sshll.u32 %s317_s23, 4  ;;  %s2648_s17 = scalar_lea.hbm %s2992_s21, 55296  ;;  %s2998_s19 = int_to_ptr.vmem [resolvable:$true] %s324_s19 }
  0x91   : > { %p2649_p13 = scmp.ne.s32.totalorder %s2992_s21, %s2648_s17  ;;  %p2650_p0 = pneg %p2994_p5 }
  0x92   : > { %s2653_s15 = scalar_lea.hbm %s3543_s1, 147456  ;;  %p2654_p6 = scmp.lt.u32.totalorder %s2992_s21, %s3543_s1 }
  0x93   : > { %p2651_p2 = pnand %p2650_p0, %p2649_p13  ;;  %p2655_p7 = scmp.lt.u32.totalorder %s2653_s15, %s2648_s17 }
  0x94   : > { %p2657_p3 = scmp.lt.u32.totalorder %s2648_s17, %s2992_s21 }
  0x95   : > { %p2652_p4 = pneg %p2651_p2  ;;  %p2656_p1 = por %p2655_p7, %p2654_p6 }
  0x97   : > { %p2658_p8 = por %p2657_p3, %p2656_p1 }
  0x99   : > { %p2659_p9 = pnand %p2658_p8, %p2652_p4 }
  0x9b   : > { %2662 = shalt.err (!%p2659_p9)
}
  0x9c   : > { %s2663_s16 = scalar_lea.vmem %s2998_s19, 55296  ;;  %s2738_s18 = smov [#allocation5]  }
  0x9d   : > { %p2664_p10 = scmp.ne.s32.totalorder %s2998_s19, %s2663_s16  ;;  %s2668_s20 = sshll.u32 %s2738_s18, 4  ;;  %s2669_s20 = int_to_ptr.vmem [resolvable:$false] %s2668_s20 }
  0x9e   : > { %s2670_s22 = scalar_lea.vmem %s2669_s20, 110592  ;;  %p2671_p2 = scmp.lt.s32.totalorder %s2998_s19, %s2669_s20 }
  0x9f   : > { %p2666_p11 = pnand %p2664_p10, %p2650_p0  ;;  %p2672_p6 = scmp.lt.s32.totalorder %s2670_s22, %s2663_s16 }
  0xa1   : > { %p2667_p13 = pneg %p2666_p11  ;;  %p2673_p7 = por %p2672_p6, %p2671_p2 }
  0xa3   : > { %p2674_p1 = pnand %p2673_p7, %p2667_p13 }
  0xa5   : > { %2677 = shalt.err (!%p2674_p1)
}
  0xa6   : > { %s2739_s23 = smov 384   ;;  %s2740_s17 = smov 24  }
  0xa7   : > { %2426 = dma.hbm_to_vmem [thread:$0]  (!%p2994_p5), %s2992_s21, 55296, %s2998_s19, %s3000_s30, %s2739_s23, %s2739_s23, %s2740_s17  }
  0xa8   : > { %p3559_p0 = scmp.ne.s32.totalorder %s3553_s12, 0 }
  0xa9   : > { %p3560_p4 = scmp.eq.s32.totalorder (!%p3559_p0), %s2812_s11, 0 }
  0xaa   : > { %343 = sbr.rel (%p3559_p0) target bundleno = 767 (0x2ff), region = 52 }
  0xb1   : > { %2695 = dma.done.wait (%p3560_p4), [#allocation4], 16   ;;  %p3561_p3 = pmov %p3560_p4 }
  0xb2   : > { %s349_s24 = sand.u32 1, %s2720_s28  }
  0xb3   : > { %2697 = vsyncadd (%p3561_p3), [#allocation4], 4294967280  ;;  %s2376_s26 = smul.u32 3456, %s349_s24  ;;  %s350_s15 = scalar_lea.sflag [#allocation3], %s349_s24 }
  0xb5   : > { %s3035_s9 = scalar_lea.vmem [#allocation5], %s2376_s26 }
  0xb6   : > { %2699 = dma.done.wait (%p2983_p12), %s350_s15, 55296  }
  0xb7   : > { %2701 = vsyncadd (%p2983_p12), %s350_s15, 4294912000  ;;  %p3562_p5 = pmov %p3561_p3 }
  0xb8   : > { %p3563_p8 = pmov %p3561_p3 }
  0xb9   : > { %2703 = dma.done.wait (%p3562_p5), [#allocation7], 80  }
  0xba   : > { %2705 = vsyncadd (%p3563_p8), [#allocation7], 4294967216  ;;  %p3564_p9 = pmov %p3561_p3 }
  0xbb   : > { %p3565_p10 = pmov %p3561_p3 }
  0xbc   : > { %2707 = dma.done.wait (%p3564_p9), [#allocation10], 9280  }
  0xbd   : > { %2709 = vsyncadd (%p3565_p10), [#allocation10], 4294958016  ;;  %p3566_p11 = pmov %p3561_p3 }
  0xbe   : > { %p3567_p13 = pmov %p3561_p3 }
  0xbf   : > { %2711 = dma.done.wait (%p3566_p11), [#allocation13], 16  }
  0xc0   : > { %2713 = vsyncadd (%p3567_p13), [#allocation13], 4294967280 }
  0xc1   : > { %378 = sfence }
  0xc2   : > { %v1411_v0 = vld [vmem:[#allocation11 + $0x80] sm:$0xff]  ;;  %v1412_v1 = vld [vmem:[#allocation11 + $0x88] sm:$0xff]  ;;  %v1413_v11 = vld [vmem:[#allocation11 + $0x90] sm:$0xff]  ;;  %p410_p12 = scmp.lt.s32.totalorder %s2812_s11, 1  ;;  %v1360_v47 = vlaneseq  ;;  %vm2742_vm0 = vmmov 0   ;;  %vm1492_vm1 = vcmask 523264  }
  0xc3   : > { %v1443_v2 = vld [vmem:[#allocation11 + $0x180] sm:$0xff]  ;;  %v2298_v3 = vpack.c.bf16 %v1412_v1, %v1411_v0  ;;  %v1444_v4 = vld [vmem:[#allocation11 + $0x188] sm:$0xff]  ;;  %v1414_v13 = vld [vmem:[#allocation11 + $0x98] sm:$0xff]  ;;  %vm1329_vm2 = vcmask 1040384   ;;  %vm1333_vm3 = vcmask 1041408   ;;  %vm1337_vm4 = vcmask 1042432  }
  0xc4   : > { %v1395_v5 = vld [vmem:[#allocation11] sm:$0xff]  ;;  %v1396_v6 = vld [vmem:[#allocation11 + $0x8] sm:$0xff]  ;;  %v2330_v7 = vpack.c.bf16 %v1444_v4, %v1443_v2  ;;  %v1445_v14 = vld [vmem:[#allocation11 + $0x190] sm:$0xff]  ;;  %v2302_v16 = vpack.c.bf16 %v1414_v13, %v1413_v11  ;;  %s3573_s11 = smov (!%p410_p12, %s2812_s11), 1  ;;  %v3061_v61 = vshrl.u32 %v1360_v47, 7  ;;  %s1387_s19 = sld [smem:[#allocation2]] }
  0xc5   : > { %v2300_v8 = vpack.c.bf16 %v1396_v6, %v1395_v5  ;;  %v1427_v9 = vld [vmem:[#allocation11 + $0x100] sm:$0xff]  ;;  %v1428_v10 = vld [vmem:[#allocation11 + $0x108] sm:$0xff]  ;;  %2299 = vmatprep.subr.bf16.mxu0 %v2298_v3  ;;  %v1446_v15 = vld [vmem:[#allocation11 + $0x198] sm:$0xff]  ;;  %s2377_s12 = smul.u32 5, %s3573_s11  ;;  %s2194_s30 = sld [smem:[#allocation2 + $0x1]]  ;;  %vm1348_vm5 = vcmask 256000  }
  0xc6   : > { %v2332_v12 = vpack.c.bf16 %v1428_v10, %v1427_v9  ;;  %2331 = vmatprep.subr.bf16.mxu1 %v2330_v7  ;;  %v2334_v17 = vpack.c.bf16 %v1446_v15, %v1445_v14  ;;  %v1397_v18 = vld [vmem:[#allocation11 + $0x10] sm:$0xff]  ;;  %v1398_v19 = vld [vmem:[#allocation11 + $0x18] sm:$0xff]  ;;  %v1415_v23 = vld [vmem:[#allocation11 + $0xa0] sm:$0xff]  ;;  %v1474_v10 = vsub.s32 1, %v3061_v61  ;;  %v1482_v11 = vsub.s32 3, %v3061_v61  ;;  %s2195_s10 = sld [smem:[#allocation2 + $0x2]] }
  0xc7   : > { %2301 = vmatpush3.bf16.msra.mxu0 %v2300_v8  ;;  %v1429_v20 = vld [vmem:[#allocation11 + $0x110] sm:$0xff]  ;;  %v2304_v21 = vpack.c.bf16 %v1398_v19, %v1397_v18  ;;  %v1430_v22 = vld [vmem:[#allocation11 + $0x118] sm:$0xff]  ;;  %v1416_v24 = vld [vmem:[#allocation11 + $0xa8] sm:$0xff]  ;;  %s413_s27 = scalar_lea.vmem %s3544_s2, %s2377_s12  ;;  %s2196_s16 = sld [smem:[#allocation2 + $0x3]]  ;;  %vm1366_vm6 = vcmask 257024   ;;  %vm1727_vm11 = vcmask 261120  }
  0xc8   : > { %2333 = vmatpush3.bf16.msra.mxu1 %v2332_v12  ;;  %2303 = vmatprep.subr.bf16.mxu0 %v2302_v16  ;;  %v2336_v25 = vpack.c.bf16 %v1430_v22, %v1429_v20  ;;  %v2306_v26 = vpack.c.bf16 %v1416_v24, %v1415_v23  ;;  %v1447_v27 = vld [vmem:[#allocation11 + $0x1a0] sm:$0xff]  ;;  %v1448_v28 = vld [vmem:[#allocation11 + $0x1a8] sm:$0xff]  ;;  %v1417_v35 = vld [vmem:[#allocation11 + $0xb0] sm:$0xff]  ;;  %s2744_s23 = smov 32   ;;  %s1905_s17 = sshll.u32 %s3573_s11, 1  ;;  %vm1748_vm12 = vcmp.lt.s32.totalorder %v1360_v47, 160 }
  0xc9   : > { %2335 = vmatprep.subr.bf16.mxu1 %v2334_v17  ;;  %v1399_v29 = vld [vmem:[#allocation11 + $0x20] sm:$0xff]  ;;  %v2338_v30 = vpack.c.bf16 %v1448_v28, %v1447_v27  ;;  %v1400_v31 = vld [vmem:[#allocation11 + $0x28] sm:$0xff]  ;;  %v1418_v36 = vld [vmem:[#allocation11 + $0xb8] sm:$0xff]  ;;  %s417_s15 = scalar_lea.vmem %s3550_s8, %s1905_s17 }
  0xca   : > { %v1431_v32 = vld [vmem:[#allocation11 + $0x120] sm:$0xff]  ;;  %v1432_v33 = vld [vmem:[#allocation11 + $0x128] sm:$0xff]  ;;  %v2308_v34 = vpack.c.bf16 %v1400_v31, %v1399_v29  ;;  %v1449_v37 = vld [vmem:[#allocation11 + $0x1b0] sm:$0xff]  ;;  %v2310_v39 = vpack.c.bf16 %v1418_v36, %v1417_v35 }
  0xcb   : > { %2305 = vmatpush3.bf16.msra.mxu0 %v2304_v21  ;;  %v2340_v38 = vpack.c.bf16 %v1432_v33, %v1431_v32  ;;  %v1450_v40 = vld [vmem:[#allocation11 + $0x1b8] sm:$0xff]  ;;  %v1401_v41 = vld [vmem:[#allocation11 + $0x30] sm:$0xff]  ;;  %v1419_v46 = vld [vmem:[#allocation11 + $0xc0] sm:$0xff]  ;;  %s1389_s18 = smul.f32 %s2194_s30, %s1387_s19 }
  0xcc   : > { %2337 = vmatpush3.bf16.msra.mxu1 %v2336_v25  ;;  %2307 = vmatprep.subr.bf16.mxu0 %v2306_v26  ;;  %v1402_v42 = vld [vmem:[#allocation11 + $0x38] sm:$0xff]  ;;  %v2342_v43 = vpack.c.bf16 %v1450_v40, %v1449_v37  ;;  %v1433_v44 = vld [vmem:[#allocation11 + $0x130] sm:$0xff]  ;;  %v1420_v48 = vld [vmem:[#allocation11 + $0xc8] sm:$0xff] }
  0xcd   : > { %2339 = vmatprep.subr.bf16.mxu1 %v2338_v30  ;;  %v1434_v45 = vld [vmem:[#allocation11 + $0x138] sm:$0xff]  ;;  %v1451_v49 = vld [vmem:[#allocation11 + $0x1c0] sm:$0xff]  ;;  %v1452_v50 = vld [vmem:[#allocation11 + $0x1c8] sm:$0xff]  ;;  %v2312_v51 = vpack.c.bf16 %v1402_v42, %v1401_v41  ;;  %v2314_v53 = vpack.c.bf16 %v1420_v48, %v1419_v46  ;;  %v1362_v48 = vsub.s32 0, %v3061_v61  ;;  %s1391_s20 = smul.f32 %s2195_s10, %s1389_s18 }
  0xce   : > { %v2344_v52 = vpack.c.bf16 %v1434_v45, %v1433_v44  ;;  %v1403_v54 = vld [vmem:[#allocation11 + $0x40] sm:$0xff]  ;;  %v1404_v55 = vld [vmem:[#allocation11 + $0x48] sm:$0xff]  ;;  %v2346_v57 = vpack.c.bf16 %v1452_v50, %v1451_v49  ;;  %v1421_v59 = vld [vmem:[#allocation11 + $0xd0] sm:$0xff] }
  0xcf   : > { %2309 = vmatpush3.bf16.msra.mxu0 %v2308_v34  ;;  %v1435_v56 = vld [vmem:[#allocation11 + $0x140] sm:$0xff]  ;;  %v1436_v58 = vld [vmem:[#allocation11 + $0x148] sm:$0xff]  ;;  %v1422_v60 = vld [vmem:[#allocation11 + $0xd8] sm:$0xff]  ;;  %v2316_v0 = vpack.c.bf16 %v1404_v55, %v1403_v54  ;;  %v1478_v54 = vsub.s32 2, %v3061_v61  ;;  %s1393_s22 = smul.f32 %s2196_s16, %s1391_s20 }
  0xd0   : > { %2341 = vmatpush3.bf16.msra.mxu1 %v2340_v38  ;;  %2311 = vmatprep.subr.bf16.mxu0 %v2310_v39  ;;  %v1453_v62 = vld [vmem:[#allocation11 + $0x1d0] sm:$0xff]  ;;  %v1454_v63 = vld [vmem:[#allocation11 + $0x1d8] sm:$0xff]  ;;  %v2348_v1 = vpack.c.bf16 %v1436_v58, %v1435_v56  ;;  %v2318_v2 = vpack.c.bf16 %v1422_v60, %v1421_v59  ;;  %v1423_v8 = vld [vmem:[#allocation11 + $0xe0] sm:$0xff] }
  0xd1   : > { %2343 = vmatprep.subr.bf16.mxu1 %v2342_v43  ;;  %v1405_v3 = vld [vmem:[#allocation11 + $0x50] sm:$0xff]  ;;  %v1406_v4 = vld [vmem:[#allocation11 + $0x58] sm:$0xff]  ;;  %v2350_v6 = vpack.c.bf16 %v1454_v63, %v1453_v62  ;;  %v1424_v9 = vld [vmem:[#allocation11 + $0xe8] sm:$0xff] }
  0xd2   : > { %v1437_v5 = vld [vmem:[#allocation11 + $0x150] sm:$0xff]  ;;  %v1438_v7 = vld [vmem:[#allocation11 + $0x158] sm:$0xff]  ;;  %v1455_v12 = vld [vmem:[#allocation11 + $0x1e0] sm:$0xff]  ;;  %v2320_v14 = vpack.c.bf16 %v1406_v4, %v1405_v3  ;;  %v2322_v18 = vpack.c.bf16 %v1424_v9, %v1423_v8 }
  0xd3   : > { %2313 = vmatpush3.bf16.msra.mxu0 %v2312_v51  ;;  %v1456_v13 = vld [vmem:[#allocation11 + $0x1e8] sm:$0xff]  ;;  %v1407_v15 = vld [vmem:[#allocation11 + $0x60] sm:$0xff]  ;;  %v2352_v17 = vpack.c.bf16 %v1438_v7, %v1437_v5  ;;  %v3068_v21 = vld [vmem:[%s413_s27] sm:$0x1f] }
  0xd4   : > { %2345 = vmatpush3.bf16.msra.mxu1 %v2344_v52  ;;  %2315 = vmatprep.subr.bf16.mxu0 %v2314_v53  ;;  %v1408_v16 = vld [vmem:[#allocation11 + $0x68] sm:$0xff]  ;;  %v1439_v19 = vld [vmem:[#allocation11 + $0x160] sm:$0xff]  ;;  %v2354_v22 = vpack.c.bf16 %v1456_v13, %v1455_v12  ;;  %v1425_v23 = vld [vmem:[#allocation11 + $0xf0] sm:$0xff]  ;;  %v1475_v26 = vrot.slane %v3068_v21, %v1474_v10  ;;  %v1483_v27 = vrot.slane %v3068_v21, %v1482_v11 }
  0xd5   : > { %2347 = vmatprep.subr.bf16.mxu1 %v2346_v57  ;;  %v1440_v20 = vld [vmem:[#allocation11 + $0x168] sm:$0xff]  ;;  %v1426_v24 = vld [vmem:[#allocation11 + $0xf8] sm:$0xff]  ;;  %v1457_v25 = vld [vmem:[#allocation11 + $0x1f0] sm:$0xff]  ;;  %v2324_v31 = vpack.c.bf16 %v1408_v16, %v1407_v15  ;;  %v1471_v4 = vrot.slane %v3068_v21, %v1362_v48  ;;  %v1479_v8 = vrot.slane %v3068_v21, %v1478_v54 }
  0xd6   : > { %v1458_v28 = vld [vmem:[#allocation11 + $0x1f8] sm:$0xff]  ;;  %v1409_v29 = vld [vmem:[#allocation11 + $0x70] sm:$0xff]  ;;  %1559 = vmatprep.mubr.f32.mxu0 %v1475_v26  ;;  %v2356_v36 = vpack.c.bf16 %v1440_v20, %v1439_v19  ;;  %v2326_v37 = vpack.c.bf16 %v1426_v24, %v1425_v23  ;;  %v420_v38 = vld [vmem:[%s3035_s9 + $0x10] sm:$0xff]  ;;  %1629 = vmatprep.mubr.f32.mxu1 %v1483_v27 }
  0xd7   : > { %2317 = vmatpush3.bf16.msra.mxu0 %v2316_v0  ;;  %v1410_v30 = vld [vmem:[#allocation11 + $0x78] sm:$0xff]  ;;  %v1441_v32 = vld [vmem:[#allocation11 + $0x170] sm:$0xff]  ;;  %v2358_v41 = vpack.c.bf16 %v1458_v28, %v1457_v25  ;;  %v424_v43 = vld [vmem:[%s3035_s9 + $0x30] sm:$0xff] }
  0xd8   : > { %2349 = vmatpush3.bf16.msra.mxu1 %v2348_v1  ;;  %2319 = vmatprep.subr.bf16.mxu0 %v2318_v2  ;;  %v1442_v33 = vld [vmem:[#allocation11 + $0x178] sm:$0xff]  ;;  %v421_v39 = vld [vmem:[%s3035_s9 + $0x18] sm:$0xff]  ;;  %v428_v51 = vld [vmem:[%s3035_s9 + $0x50] sm:$0xff]  ;;  %v2328_v53 = vpack.c.bf16 %v1410_v30, %v1409_v29  ;;  %v2743_v30 = vmov 0.0  }
  0xd9   : > { %2351 = vmatprep.subr.bf16.mxu1 %v2350_v6  ;;  %v418_v34 = vld [vmem:[%s3035_s9] sm:$0xff]  ;;  %v419_v35 = vld [vmem:[%s3035_s9 + $0x8] sm:$0xff]  ;;  %v425_v44 = vld [vmem:[%s3035_s9 + $0x38] sm:$0xff]  ;;  %v2360_v59 = vpack.c.bf16 %v1442_v33, %v1441_v32 }
  0xda   : > { %v422_v40 = vld [vmem:[%s3035_s9 + $0x20] sm:$0xff]  ;;  %v423_v42 = vld [vmem:[%s3035_s9 + $0x28] sm:$0xff]  ;;  %v562_v45 = vadd.f32 %v421_v39, %v418_v34  ;;  %v429_v56 = vld [vmem:[%s3035_s9 + $0x58] sm:$0xff] }
  0xdb   : > { %2321 = vmatpush3.bf16.msra.mxu0 %v2320_v14  ;;  %v615_v46 = vadd.f32 %v422_v40, %v419_v35  ;;  %v426_v49 = vld [vmem:[%s3035_s9 + $0x40] sm:$0xff]  ;;  %v427_v50 = vld [vmem:[%s3035_s9 + $0x48] sm:$0xff]  ;;  %v668_v52 = vadd.f32 %v423_v42, %v420_v38  ;;  %v1460_v60 = vld [vmem:[#allocation11 + $0x208] sm:$0xff]  ;;  %v2741_v14 = vmov 0.0|0.0  }
  0xdc   : > { %2353 = vmatpush3.bf16.msra.mxu1 %v2352_v17  ;;  %2323 = vmatprep.subr.bf16.mxu0 %v2322_v18  ;;  %v1459_v55 = vld [vmem:[#allocation11 + $0x200] sm:$0xff]  ;;  %v563_v57 = vadd.f32 %v562_v45, %v424_v43  ;;  %v430_v62 = vld [vmem:[%s3035_s9 + $0x60] sm:$0xff]  ;;  %v433_v5 = vld [vmem:[%s3035_s9 + $0x78] sm:$0xff] }
  0xdd   : > { %2355 = vmatprep.subr.bf16.mxu1 %v2354_v22  ;;  %v616_v58 = vadd.f32 %v615_v46, %v425_v44  ;;  %v431_v63 = vld [vmem:[%s3035_s9 + $0x68] sm:$0xff]  ;;  %v669_v0 = vadd.f32 %v668_v52, %v426_v49  ;;  %v432_v1 = vld [vmem:[%s3035_s9 + $0x70] sm:$0xff]  ;;  %v434_v6 = vld [vmem:[%s3035_s9 + $0x80] sm:$0xff]  ;;  %v2363_v9 = vpack.c.bf16 %v1460_v60, %v1459_v55  ;;  %v1486_v44 = vsub.s32 4, %v3061_v61 }
  0xde   : > { %v564_v2 = vadd.f32 %v563_v57, %v427_v50  ;;  %v1461_v10 = vld [vmem:[#allocation11 + $0x210] sm:$0xff]  ;;  %v1462_v11 = vld [vmem:[#allocation11 + $0x218] sm:$0xff]  ;;  %v436_v16 = vld [vmem:[%s3035_s9 + $0x90] sm:$0xff] }
  0xdf   : > { %2325 = vmatpush3.bf16.msra.mxu0 %v2324_v31  ;;  %v617_v3 = vadd.f32 %v616_v58, %v428_v51  ;;  %v670_v7 = vadd.f32 %v669_v0, %v429_v56  ;;  %v435_v15 = vld [vmem:[%s3035_s9 + $0x88] sm:$0xff]  ;;  %v437_v17 = vld [vmem:[%s3035_s9 + $0x98] sm:$0xff]  ;;  %v2366_v22 = vpack.c.bf16 %v1462_v11, %v1461_v10  ;;  %v440_v24 = vld [vmem:[%s3035_s9 + $0xb0] sm:$0xff]  ;;  %v1487_v54 = vrot.slane %v3068_v21, %v1486_v44 }
  0xe0   : > { %2357 = vmatpush3.bf16.msra.mxu1 %v2356_v36  ;;  %2327 = vmatprep.subr.bf16.mxu0 %v2326_v37  ;;  %v565_v12 = vadd.f32 %v564_v2, %v430_v62  ;;  %v439_v23 = vld [vmem:[%s3035_s9 + $0xa8] sm:$0xff]  ;;  %v1464_v29 = vld [vmem:[#allocation11 + $0x228] sm:$0xff]  ;;  %v438_v31 = vld [vmem:[%s3035_s9 + $0xa0] sm:$0xff] }
  0xe1   : > { %2359 = vmatprep.subr.bf16.mxu1 %v2358_v41  ;;  %v618_v13 = vadd.f32 %v617_v3, %v431_v63  ;;  %v671_v18 = vadd.f32 %v670_v7, %v432_v1  ;;  %v1463_v28 = vld [vmem:[#allocation11 + $0x220] sm:$0xff]  ;;  %v442_v32 = vld [vmem:[%s3035_s9 + $0xc0] sm:$0xff]  ;;  %v441_v40 = vld [vmem:[%s3035_s9 + $0xb8] sm:$0xff] }
  0xe2   : > { %v566_v19 = vadd.f32 %v565_v12, %v433_v5  ;;  %v443_v35 = vld [vmem:[%s3035_s9 + $0xc8] sm:$0xff]  ;;  %v2369_v36 = vpack.c.bf16 %v1464_v29, %v1463_v28  ;;  %v1465_v38 = vld [vmem:[#allocation11 + $0x230] sm:$0xff]  ;;  %v444_v50 = vld [vmem:[%s3035_s9 + $0xd0] sm:$0xff] }
  0xe3   : > { %2329 = vmatpush3.bf16.msra.mxu0 %v2328_v53  ;;  %v619_v20 = vadd.f32 %v618_v13, %v434_v6  ;;  %v672_v27 = vadd.f32 %v671_v18, %v435_v15  ;;  %v1466_v39 = vld [vmem:[#allocation11 + $0x238] sm:$0xff]  ;;  %v445_v42 = vld [vmem:[%s3035_s9 + $0xd8] sm:$0xff]  ;;  %v448_v52 = vld [vmem:[%s3035_s9 + $0xf0] sm:$0xff] }
  0xe4   : > { %2361 = vmatpush3.bf16.msra.mxu1 %v2360_v59  ;;  %2362 = vmatprep.subr.bf16.mxu0 %v2741_v14  ;;  %v567_v25 = vadd.f32 %v566_v19, %v436_v16  ;;  %v446_v45 = vld [vmem:[%s3035_s9 + $0xe0] sm:$0xff]  ;;  %v2372_v46 = vpack.c.bf16 %v1466_v39, %v1465_v38  ;;  %v449_v55 = vld [vmem:[%s3035_s9 + $0xf8] sm:$0xff]  ;;  %v447_v57 = vld [vmem:[%s3035_s9 + $0xe8] sm:$0xff] }
  0xe5   : > { %v620_v26 = vadd.f32 %v619_v20, %v437_v17  ;;  %v673_v37 = vadd.f32 %v672_v27, %v438_v31  ;;  %v451_v59 = vld [vmem:[%s3035_s9 + $0x108] sm:$0xff]  ;;  %v452_v62 = vld [vmem:[%s3035_s9 + $0x110] sm:$0xff]  ;;  %v450_v0 = vld [vmem:[%s3035_s9 + $0x100] sm:$0xff] }
  0xe6   : > { %1560 = vmatmul.mubr.f32.vlgmr.msra.gmra.mrb[0].mxu0 %v1471_v4  ;;  %v568_v33 = vadd.f32 %v567_v25, %v439_v23  ;;  %v454_v1 = vld [vmem:[%s3035_s9 + $0x120] sm:$0xff]  ;;  %v455_v3 = vld [vmem:[%s3035_s9 + $0x128] sm:$0xff]  ;;  %v453_v5 = vld [vmem:[%s3035_s9 + $0x118] sm:$0xff] }
  0xe7   : > { %1630 = vmatmul.mubr.f32.vlgmr.msra.gmra.mrb[0].mxu1 %v1479_v8  ;;  %2364 = vmatpush3.bf16.msra.mxu0 %v2363_v9  ;;  %v621_v34 = vadd.f32 %v620_v26, %v440_v24  ;;  %v674_v49 = vadd.f32 %v673_v37, %v441_v40  ;;  %v457_v7 = vld [vmem:[%s3035_s9 + $0x138] sm:$0xff]  ;;  %v458_v9 = vld [vmem:[%s3035_s9 + $0x140] sm:$0xff]  ;;  %v456_v11 = vld [vmem:[%s3035_s9 + $0x130] sm:$0xff] }
  0xe8   : > { %2365 = vmatprep.subr.bf16.mxu0 %v2741_v14  ;;  %2295 = vmatprep.mubr.msk.f32.mxu0 %vm2742_vm0, %v2743_v30  ;;  %v569_v41 = vadd.f32 %v568_v33, %v442_v32  ;;  %v460_v13 = vld [vmem:[%s3035_s9 + $0x150] sm:$0xff]  ;;  %v461_v15 = vld [vmem:[%s3035_s9 + $0x158] sm:$0xff]  ;;  %v459_v17 = vld [vmem:[%s3035_s9 + $0x148] sm:$0xff] }
  0xe9   : > { %v622_v43 = vadd.f32 %v621_v34, %v443_v35  ;;  %v675_v56 = vadd.f32 %v674_v49, %v444_v50  ;;  %v463_v19 = vld [vmem:[%s3035_s9 + $0x168] sm:$0xff]  ;;  %v462_v24 = vld [vmem:[%s3035_s9 + $0x160] sm:$0xff]  ;;  %v465_v28 = vld [vmem:[%s3035_s9 + $0x178] sm:$0xff] }
  0xea   : > { %v570_v51 = vadd.f32 %v569_v41, %v445_v42  ;;  %v466_v26 = vld [vmem:[%s3035_s9 + $0x180] sm:$0xff]  ;;  %v467_v29 = vld [vmem:[%s3035_s9 + $0x188] sm:$0xff]  ;;  %v469_v30 = vld [vmem:[%s3035_s9 + $0x198] sm:$0xff] }
  0xeb   : > { %2367 = vmatpush3.bf16.msra.mxu0 %v2366_v22  ;;  %v623_v53 = vadd.f32 %v622_v43, %v446_v45  ;;  %v676_v63 = vadd.f32 %v675_v56, %v447_v57  ;;  %v464_v22 = vld [vmem:[%s3035_s9 + $0x170] sm:$0xff]  ;;  %v1906_v32 = vld [vmem:[%s3035_s9 + $0x480] sm:$0xff]  ;;  %v1907_v33 = vld [vmem:[%s3035_s9 + $0x488] sm:$0xff] }
  0xec   : > { %2368 = vmatprep.subr.bf16.mxu0 %v2741_v14  ;;  %v571_v58 = vadd.f32 %v570_v51, %v448_v52  ;;  %v470_v34 = vld [vmem:[%s3035_s9 + $0x1a0] sm:$0xff]  ;;  %v1909_v37 = vld [vmem:[%s3035_s9 + $0x498] sm:$0xff]  ;;  %v1911_v40 = vld [vmem:[%s3035_s9 + $0x4a8] sm:$0xff] }
  0xed   : > { %v624_v60 = vadd.f32 %v623_v53, %v449_v55  ;;  %v677_v4 = vadd.f32 %v676_v63, %v450_v0  ;;  %v1910_v38 = vld [vmem:[%s3035_s9 + $0x4a0] sm:$0xff]  ;;  %v1912_v41 = vld [vmem:[%s3035_s9 + $0x4b0] sm:$0xff]  ;;  %v1913_v42 = vld [vmem:[%s3035_s9 + $0x4b8] sm:$0xff]  ;;  %v866_v43 = vadd.f32 %v1909_v37, %v1906_v32 }
  0xee   : > { %v572_v21 = vadd.f32 %v571_v58, %v451_v59  ;;  %v919_v44 = vadd.f32 %v1910_v38, %v1907_v33  ;;  %v1914_v45 = vld [vmem:[%s3035_s9 + $0x4c0] sm:$0xff]  ;;  %v1916_v49 = vld [vmem:[%s3035_s9 + $0x4d0] sm:$0xff]  ;;  %v1917_v52 = vld [vmem:[%s3035_s9 + $0x4d8] sm:$0xff] }
  0xef   : > { %2370 = vmatpush3.bf16.msra.mxu0 %v2369_v36  ;;  %v625_v2 = vadd.f32 %v624_v60, %v452_v62  ;;  %v678_v10 = vadd.f32 %v677_v4, %v453_v5  ;;  %v1908_v36 = vld [vmem:[%s3035_s9 + $0x490] sm:$0xff]  ;;  %v867_v53 = vadd.f32 %v1912_v41, %v866_v43  ;;  %v1918_v57 = vld [vmem:[%s3035_s9 + $0x4e0] sm:$0xff]  ;;  %v1919_v58 = vld [vmem:[%s3035_s9 + $0x4e8] sm:$0xff] }
  0xf0   : > { %2371 = vmatprep.subr.bf16.mxu0 %v2741_v14  ;;  %v573_v6 = vadd.f32 %v572_v21, %v454_v1  ;;  %v972_v50 = vadd.f32 %v1911_v40, %v1908_v36  ;;  %v468_v55 = vld [vmem:[%s3035_s9 + $0x190] sm:$0xff]  ;;  %v473_v1 = vld [vmem:[%s3035_s9 + $0x1b8] sm:$0xff]  ;;  %v478_v33 = vld [vmem:[%s3035_s9 + $0x1e0] sm:$0xff] }
  0xf1   : > { %v626_v8 = vadd.f32 %v625_v2, %v455_v3  ;;  %v679_v16 = vadd.f32 %v678_v10, %v456_v11  ;;  %v472_v60 = vld [vmem:[%s3035_s9 + $0x1b0] sm:$0xff]  ;;  %v1921_v2 = vld [vmem:[%s3035_s9 + $0x4f8] sm:$0xff]  ;;  %v1922_v3 = vld [vmem:[%s3035_s9 + $0x500] sm:$0xff] }
  0xf2   : > { %v574_v12 = vadd.f32 %v573_v6, %v457_v7  ;;  %v973_v59 = vadd.f32 %v1914_v45, %v972_v50  ;;  %v1920_v63 = vld [vmem:[%s3035_s9 + $0x4f0] sm:$0xff]  ;;  %v1923_v6 = vld [vmem:[%s3035_s9 + $0x508] sm:$0xff]  ;;  %v1934_v40 = vld [vmem:[%s3035_s9 + $0x560] sm:$0xff] }
  0xf3   : > { %2373 = vmatpush3.bf16.msra.mxu0 %v2372_v46  ;;  %v627_v14 = vadd.f32 %v626_v8, %v458_v9  ;;  %v680_v23 = vadd.f32 %v679_v16, %v459_v17  ;;  %v1915_v46 = vld [vmem:[%s3035_s9 + $0x4c8] sm:$0xff]  ;;  %v1924_v11 = vld [vmem:[%s3035_s9 + $0x510] sm:$0xff]  ;;  %v1926_v16 = vld [vmem:[%s3035_s9 + $0x520] sm:$0xff] }
  0xf4   : > { %v575_v18 = vadd.f32 %v574_v12, %v460_v13  ;;  %v868_v0 = vadd.f32 %v1915_v46, %v867_v53  ;;  %v974_v4 = vadd.f32 %v1917_v52, %v973_v59  ;;  %v471_v9 = vld [vmem:[%s3035_s9 + $0x1a8] sm:$0xff]  ;;  %v1925_v12 = vld [vmem:[%s3035_s9 + $0x518] sm:$0xff]  ;;  %v1936_v50 = vld [vmem:[%s3035_s9 + $0x570] sm:$0xff] }
  0xf5   : > { %v628_v20 = vadd.f32 %v627_v14, %v461_v15  ;;  %v681_v31 = vadd.f32 %v680_v23, %v462_v24  ;;  %v475_v14 = vld [vmem:[%s3035_s9 + $0x1c8] sm:$0xff]  ;;  %v477_v46 = vld [vmem:[%s3035_s9 + $0x1d8] sm:$0xff] }
  0xf6   : > { %2296 = vmatmul.mubr.msk.f32.vlgmr.msra.gmra.mrb[2].mxu0 %vm1492_vm1, %v1487_v54  ;;  %v576_v25 = vadd.f32 %v575_v18, %v463_v19  ;;  %v920_v54 = vadd.f32 %v1913_v42, %v919_v44  ;;  %v869_v7 = vadd.f32 %v1918_v57, %v868_v0  ;;  %v975_v13 = vadd.f32 %v1920_v63, %v974_v4  ;;  %v476_v19 = vld [vmem:[%s3035_s9 + $0x1d0] sm:$0xff]  ;;  %v479_v38 = vld [vmem:[%s3035_s9 + $0x1e8] sm:$0xff]  ;;  %v481_v53 = vld [vmem:[%s3035_s9 + $0x1f8] sm:$0xff] }
  0xf7   : > { %v629_v27 = vadd.f32 %v628_v20, %v464_v22  ;;  %v682_v51 = vadd.f32 %v681_v31, %v465_v28  ;;  %v1927_v20 = vld [vmem:[%s3035_s9 + $0x528] sm:$0xff]  ;;  %v1928_v22 = vld [vmem:[%s3035_s9 + $0x530] sm:$0xff]  ;;  %v474_v28 = vld [vmem:[%s3035_s9 + $0x1c0] sm:$0xff] }
  0xf8   : > { %v577_v35 = vadd.f32 %v576_v25, %v466_v26  ;;  %v921_v21 = vadd.f32 %v1916_v49, %v920_v54  ;;  %v870_v17 = vadd.f32 %v1921_v2, %v869_v7  ;;  %v976_v23 = vadd.f32 %v1923_v6, %v975_v13  ;;  %v1929_v25 = vld [vmem:[%s3035_s9 + $0x538] sm:$0xff]  ;;  %v1931_v31 = vld [vmem:[%s3035_s9 + $0x548] sm:$0xff]  ;;  %v480_v2 = vld [vmem:[%s3035_s9 + $0x1f0] sm:$0xff] }
  0xf9   : > { %v630_v39 = vadd.f32 %v629_v27, %v467_v29  ;;  %v683_v5 = vadd.f32 %v682_v51, %v468_v55  ;;  %v1935_v43 = vld [vmem:[%s3035_s9 + $0x568] sm:$0xff]  ;;  %v1937_v51 = vld [vmem:[%s3035_s9 + $0x578] sm:$0xff]  ;;  %v1938_v55 = vld [vmem:[%s3035_s9 + $0x580] sm:$0xff] }
  0xfa   : > { %v578_v56 = vadd.f32 %v577_v35, %v469_v30  ;;  %v922_v8 = vadd.f32 %v1919_v58, %v921_v21  ;;  %v871_v26 = vadd.f32 %v1924_v11, %v870_v17  ;;  %v1930_v30 = vld [vmem:[%s3035_s9 + $0x540] sm:$0xff]  ;;  %v977_v32 = vadd.f32 %v1926_v16, %v976_v23  ;;  %v1932_v35 = vld [vmem:[%s3035_s9 + $0x550] sm:$0xff]  ;;  %v1939_v59 = vld [vmem:[%s3035_s9 + $0x588] sm:$0xff] }
  0xfb   : > { %v631_v62 = vadd.f32 %v630_v39, %v470_v34  ;;  %v684_v24 = vadd.f32 %v683_v5, %v471_v9  ;;  %v1933_v39 = vld [vmem:[%s3035_s9 + $0x558] sm:$0xff]  ;;  %v482_v58 = vld [vmem:[%s3035_s9 + $0x200] sm:$0xff]  ;;  %v1943_v5 = vld [vmem:[%s3035_s9 + $0x5a8] sm:$0xff] }
  0xfc   : > { %v579_v10 = vadd.f32 %v578_v56, %v472_v60  ;;  %v923_v18 = vadd.f32 %v1922_v3, %v922_v8  ;;  %v872_v36 = vadd.f32 %v1927_v20, %v871_v26  ;;  %v978_v41 = vadd.f32 %v1929_v25, %v977_v32  ;;  %v1940_v60 = vld [vmem:[%s3035_s9 + $0x590] sm:$0xff]  ;;  %v1941_v0 = vld [vmem:[%s3035_s9 + $0x598] sm:$0xff]  ;;  %v1942_v4 = vld [vmem:[%s3035_s9 + $0x5a0] sm:$0xff] }
  0xfd   : > { %v632_v15 = vadd.f32 %v631_v62, %v473_v1  ;;  %v685_v42 = vadd.f32 %v684_v24, %v474_v28  ;;  %v484_v7 = vld [vmem:[%s3035_s9 + $0x210] sm:$0xff]  ;;  %v1945_v13 = vld [vmem:[%s3035_s9 + $0x5b8] sm:$0xff]  ;;  %v1947_v17 = vld [vmem:[%s3035_s9 + $0x5c8] sm:$0xff] }
  0xfe   : > { %v924_v27 = vadd.f32 %v1925_v12, %v923_v18  ;;  %v580_v29 = vadd.f32 %v579_v10, %v475_v14  ;;  %v873_v44 = vadd.f32 %v1930_v30, %v872_v36  ;;  %v979_v52 = vadd.f32 %v1932_v35, %v978_v41  ;;  %v1944_v9 = vld [vmem:[%s3035_s9 + $0x5b0] sm:$0xff]  ;;  %v485_v12 = vld [vmem:[%s3035_s9 + $0x218] sm:$0xff]  ;;  %v1946_v14 = vld [vmem:[%s3035_s9 + $0x5c0] sm:$0xff] }
  0xff   : > { %v633_v34 = vadd.f32 %v632_v15, %v476_v19  ;;  %v686_v63 = vadd.f32 %v685_v42, %v477_v46  ;;  %v483_v20 = vld [vmem:[%s3035_s9 + $0x208] sm:$0xff]  ;;  %v1948_v23 = vld [vmem:[%s3035_s9 + $0x5d0] sm:$0xff]  ;;  %v1949_v24 = vld [vmem:[%s3035_s9 + $0x5d8] sm:$0xff] }
 0x100   : > { %v925_v37 = vadd.f32 %v1928_v22, %v924_v27  ;;  %v581_v49 = vadd.f32 %v580_v29, %v478_v33  ;;  %v874_v56 = vadd.f32 %v1933_v39, %v873_v44  ;;  %v980_v62 = vadd.f32 %v1935_v43, %v979_v52  ;;  %v487_v26 = vld [vmem:[%s3035_s9 + $0x228] sm:$0xff]  ;;  %v1950_v28 = vld [vmem:[%s3035_s9 + $0x5e0] sm:$0xff]  ;;  %v1952_v33 = vld [vmem:[%s3035_s9 + $0x5f0] sm:$0xff] }
 0x101   : > { %v634_v54 = vadd.f32 %v633_v34, %v479_v38  ;;  %v687_v16 = vadd.f32 %v686_v63, %v480_v2  ;;  %v1951_v32 = vld [vmem:[%s3035_s9 + $0x5e8] sm:$0xff]  ;;  %v1953_v36 = vld [vmem:[%s3035_s9 + $0x5f8] sm:$0xff]  ;;  %v486_v39 = vld [vmem:[%s3035_s9 + $0x220] sm:$0xff] }
 0x102   : > { %v926_v45 = vadd.f32 %v1931_v31, %v925_v37  ;;  %v875_v21 = vadd.f32 %v1936_v50, %v874_v56  ;;  %v582_v3 = vadd.f32 %v581_v49, %v481_v53  ;;  %v981_v6 = vadd.f32 %v1938_v55, %v980_v62  ;;  %v488_v31 = vld [vmem:[%s3035_s9 + $0x230] sm:$0xff]  ;;  %v1954_v41 = vld [vmem:[%s3035_s9 + $0x600] sm:$0xff]  ;;  %v1955_v42 = vld [vmem:[%s3035_s9 + $0x608] sm:$0xff] }
 0x103   : > { %v635_v8 = vadd.f32 %v634_v54, %v482_v58  ;;  %v688_v35 = vadd.f32 %v687_v16, %v483_v20  ;;  %v490_v44 = vld [vmem:[%s3035_s9 + $0x240] sm:$0xff]  ;;  %v1956_v46 = vld [vmem:[%s3035_s9 + $0x610] sm:$0xff]  ;;  %v1957_v52 = vld [vmem:[%s3035_s9 + $0x618] sm:$0xff] }
 0x104   : > { %v927_v57 = vadd.f32 %v1934_v40, %v926_v45  ;;  %v876_v10 = vadd.f32 %v1939_v59, %v875_v21  ;;  %v982_v15 = vadd.f32 %v1941_v0, %v981_v6  ;;  %v583_v22 = vadd.f32 %v582_v3, %v484_v7  ;;  %v1958_v53 = vld [vmem:[%s3035_s9 + $0x620] sm:$0xff]  ;;  %v1959_v56 = vld [vmem:[%s3035_s9 + $0x628] sm:$0xff]  ;;  %v489_v59 = vld [vmem:[%s3035_s9 + $0x238] sm:$0xff] }
 0x105   : > { %v636_v27 = vadd.f32 %v635_v8, %v485_v12  ;;  %v689_v55 = vadd.f32 %v688_v35, %v486_v39  ;;  %v1960_v62 = vld [vmem:[%s3035_s9 + $0x630] sm:$0xff]  ;;  %v1961_v63 = vld [vmem:[%s3035_s9 + $0x638] sm:$0xff]  ;;  %v1962_v2 = vld [vmem:[%s3035_s9 + $0x640] sm:$0xff] }
 0x106   : > { %v928_v1 = vadd.f32 %v1937_v51, %v927_v57  ;;  %v877_v18 = vadd.f32 %v1942_v4, %v876_v10  ;;  %v983_v25 = vadd.f32 %v1944_v9, %v982_v15  ;;  %v584_v40 = vadd.f32 %v583_v22, %v487_v26  ;;  %v491_v51 = vld [vmem:[%s3035_s9 + $0x248] sm:$0xff]  ;;  %v493_v21 = vld [vmem:[%s3035_s9 + $0x258] sm:$0xff]  ;;  %v1964_v7 = vld [vmem:[%s3035_s9 + $0x650] sm:$0xff] }
 0x107   : > { %v637_v45 = vadd.f32 %v636_v27, %v488_v31  ;;  %v1963_v6 = vld [vmem:[%s3035_s9 + $0x648] sm:$0xff]  ;;  %v690_v9 = vadd.f32 %v689_v55, %v489_v59  ;;  %v1965_v10 = vld [vmem:[%s3035_s9 + $0x658] sm:$0xff]  ;;  %v1966_v15 = vld [vmem:[%s3035_s9 + $0x660] sm:$0xff] }
 0x108   : > { %v929_v11 = vadd.f32 %v1940_v60, %v928_v1  ;;  %v878_v29 = vadd.f32 %v1945_v13, %v877_v18  ;;  %v984_v34 = vadd.f32 %v1947_v17, %v983_v25  ;;  %v585_v60 = vadd.f32 %v584_v40, %v490_v44  ;;  %v492_v13 = vld [vmem:[%s3035_s9 + $0x250] sm:$0xff]  ;;  %v1967_v16 = vld [vmem:[%s3035_s9 + $0x668] sm:$0xff]  ;;  %v1969_v25 = vld [vmem:[%s3035_s9 + $0x678] sm:$0xff] }
 0x109   : > { %v638_v1 = vadd.f32 %v637_v45, %v491_v51  ;;  %v496_v18 = vld [vmem:[%s3035_s9 + $0x270] sm:$0xff]  ;;  %v1970_v26 = vld [vmem:[%s3035_s9 + $0x680] sm:$0xff]  ;;  %v1973_v35 = vld [vmem:[%s3035_s9 + $0x698] sm:$0xff] }
 0x10a   : > { %v930_v19 = vadd.f32 %v1943_v5, %v929_v11  ;;  %v879_v37 = vadd.f32 %v1948_v23, %v878_v29  ;;  %v985_v43 = vadd.f32 %v1950_v28, %v984_v34  ;;  %v494_v5 = vld [vmem:[%s3035_s9 + $0x260] sm:$0xff]  ;;  %v1968_v20 = vld [vmem:[%s3035_s9 + $0x670] sm:$0xff]  ;;  %v691_v28 = vadd.f32 %v690_v9, %v492_v13  ;;  %v1971_v29 = vld [vmem:[%s3035_s9 + $0x688] sm:$0xff] }
 0x10b   : > { %v1972_v34 = vld [vmem:[%s3035_s9 + $0x690] sm:$0xff]  ;;  %v1974_v39 = vld [vmem:[%s3035_s9 + $0x6a0] sm:$0xff]  ;;  %v1979_v55 = vld [vmem:[%s3035_s9 + $0x6c8] sm:$0xff] }
 0x10c   : > { %v931_v30 = vadd.f32 %v1946_v14, %v930_v19  ;;  %v880_v49 = vadd.f32 %v1951_v32, %v879_v37  ;;  %v986_v54 = vadd.f32 %v1953_v36, %v985_v43  ;;  %v586_v14 = vadd.f32 %v585_v60, %v493_v21  ;;  %v495_v32 = vld [vmem:[%s3035_s9 + $0x268] sm:$0xff]  ;;  %v1976_v44 = vld [vmem:[%s3035_s9 + $0x6b0] sm:$0xff]  ;;  %v1981_v21 = vld [vmem:[%s3035_s9 + $0x6d8] sm:$0xff] }
 0x10d   : > { %v639_v19 = vadd.f32 %v638_v1, %v494_v5  ;;  %v499_v37 = vld [vmem:[%s3035_s9 + $0x288] sm:$0xff]  ;;  %v1980_v60 = vld [vmem:[%s3035_s9 + $0x6d0] sm:$0xff]  ;;  %v1982_v1 = vld [vmem:[%s3035_s9 + $0x6e0] sm:$0xff] }
 0x10e   : > { %v932_v38 = vadd.f32 %v1949_v24, %v931_v30  ;;  %v881_v57 = vadd.f32 %v1954_v41, %v880_v49  ;;  %v987_v0 = vadd.f32 %v1956_v46, %v986_v54  ;;  %v497_v24 = vld [vmem:[%s3035_s9 + $0x278] sm:$0xff]  ;;  %v1975_v43 = vld [vmem:[%s3035_s9 + $0x6a8] sm:$0xff]  ;;  %v692_v46 = vadd.f32 %v691_v28, %v495_v32  ;;  %v1978_v54 = vld [vmem:[%s3035_s9 + $0x6c0] sm:$0xff] }
 0x10f   : > { %v1977_v49 = vld [vmem:[%s3035_s9 + $0x6b8] sm:$0xff]  ;;  %v2050_v9 = vld [vmem:[%s3035_s9 + $0x900] sm:$0xff] }
 0x110   : > { %v933_v50 = vadd.f32 %v1952_v33, %v932_v38  ;;  %v882_v3 = vadd.f32 %v1957_v52, %v881_v57  ;;  %v988_v8 = vadd.f32 %v1959_v56, %v987_v0  ;;  %v587_v33 = vadd.f32 %v586_v14, %v496_v18  ;;  %v498_v52 = vld [vmem:[%s3035_s9 + $0x280] sm:$0xff]  ;;  %v501_v0 = vld [vmem:[%s3035_s9 + $0x298] sm:$0xff] }
 0x111   : > { %v640_v38 = vadd.f32 %v639_v19, %v497_v24  ;;  %v502_v57 = vld [vmem:[%s3035_s9 + $0x2a0] sm:$0xff]  ;;  %v693_v5 = vadd.f32 %v692_v46, %v498_v52  ;;  %v2053_v14 = vld [vmem:[%s3035_s9 + $0x918] sm:$0xff]  ;;  %v1987_v24 = vld [vmem:[%s3035_s9 + $0x708] sm:$0xff] }
 0x112   : > { %v934_v58 = vadd.f32 %v1955_v42, %v933_v50  ;;  %v883_v11 = vadd.f32 %v1960_v62, %v882_v3  ;;  %v989_v17 = vadd.f32 %v1962_v2, %v988_v8  ;;  %v500_v42 = vld [vmem:[%s3035_s9 + $0x290] sm:$0xff]  ;;  %v1983_v2 = vld [vmem:[%s3035_s9 + $0x6e8] sm:$0xff]  ;;  %v1993_v52 = vld [vmem:[%s3035_s9 + $0x738] sm:$0xff] }
 0x113   : > { %v641_v59 = vadd.f32 %v640_v38, %v500_v42  ;;  %v1990_v38 = vld [vmem:[%s3035_s9 + $0x720] sm:$0xff] }
 0x114   : > { %v935_v4 = vadd.f32 %v1958_v53, %v934_v58  ;;  %v884_v22 = vadd.f32 %v1963_v6, %v883_v11  ;;  %v990_v27 = vadd.f32 %v1965_v10, %v989_v17  ;;  %v588_v53 = vadd.f32 %v587_v33, %v499_v37  ;;  %v503_v58 = vld [vmem:[%s3035_s9 + $0x2a8] sm:$0xff]  ;;  %v1984_v6 = vld [vmem:[%s3035_s9 + $0x6f0] sm:$0xff]  ;;  %v1986_v17 = vld [vmem:[%s3035_s9 + $0x700] sm:$0xff] }
 0x115   : > { %v2051_v10 = vld [vmem:[%s3035_s9 + $0x908] sm:$0xff] }
 0x116   : > { %v936_v12 = vadd.f32 %v1961_v63, %v935_v4  ;;  %v885_v30 = vadd.f32 %v1966_v15, %v884_v22  ;;  %v991_v36 = vadd.f32 %v1968_v20, %v990_v27  ;;  %v505_v4 = vld [vmem:[%s3035_s9 + $0x2b8] sm:$0xff]  ;;  %v589_v11 = vadd.f32 %v588_v53, %v502_v57  ;;  %v2054_v15 = vld [vmem:[%s3035_s9 + $0x920] sm:$0xff]  ;;  %v2056_v20 = vld [vmem:[%s3035_s9 + $0x930] sm:$0xff] }
 0x117   : > { %v2057_v22 = vld [vmem:[%s3035_s9 + $0x938] sm:$0xff]  ;;  %v1170_v27 = vadd.f32 %v2053_v14, %v2050_v9  ;;  %v1223_v28 = vadd.f32 %v2054_v15, %v2051_v10  ;;  %v1994_v53 = vld [vmem:[%s3035_s9 + $0x740] sm:$0xff]  ;;  %v507_v57 = vld [vmem:[%s3035_s9 + $0x2c8] sm:$0xff] }
 0x118   : > { %v937_v23 = vadd.f32 %v1964_v7, %v936_v12  ;;  %v886_v40 = vadd.f32 %v1969_v25, %v885_v30  ;;  %v992_v45 = vadd.f32 %v1971_v29, %v991_v36  ;;  %v1985_v12 = vld [vmem:[%s3035_s9 + $0x6f8] sm:$0xff]  ;;  %v1988_v25 = vld [vmem:[%s3035_s9 + $0x710] sm:$0xff]  ;;  %v694_v30 = vadd.f32 %v693_v5, %v501_v0  ;;  %v511_v0 = vld [vmem:[%s3035_s9 + $0x2e8] sm:$0xff] }
 0x119   : > { %v504_v29 = vld [vmem:[%s3035_s9 + $0x2b0] sm:$0xff]  ;;  %v590_v37 = vadd.f32 %v589_v11, %v505_v4  ;;  %v1224_v42 = vadd.f32 %v2057_v22, %v1223_v28  ;;  %v2055_v4 = vld [vmem:[%s3035_s9 + $0x928] sm:$0xff] }
 0x11a   : > { %v938_v31 = vadd.f32 %v1967_v16, %v937_v23  ;;  %v887_v50 = vadd.f32 %v1972_v34, %v886_v40  ;;  %v993_v56 = vadd.f32 %v1974_v39, %v992_v45  ;;  %v642_v16 = vadd.f32 %v641_v59, %v503_v58  ;;  %v506_v23 = vld [vmem:[%s3035_s9 + $0x2c0] sm:$0xff]  ;;  %v2059_v34 = vld [vmem:[%s3035_s9 + $0x948] sm:$0xff]  ;;  %v508_v36 = vld [vmem:[%s3035_s9 + $0x2d0] sm:$0xff] }
 0x11b   : > { %v1991_v39 = vld [vmem:[%s3035_s9 + $0x728] sm:$0xff]  ;;  %v1996_v58 = vld [vmem:[%s3035_s9 + $0x750] sm:$0xff] }
 0x11c   : > { %v939_v41 = vadd.f32 %v1970_v26, %v938_v31  ;;  %v888_v62 = vadd.f32 %v1975_v43, %v887_v50  ;;  %v994_v3 = vadd.f32 %v1977_v49, %v993_v56  ;;  %v1989_v31 = vld [vmem:[%s3035_s9 + $0x718] sm:$0xff]  ;;  %v2062_v49 = vld [vmem:[%s3035_s9 + $0x960] sm:$0xff]  ;;  %v2063_v50 = vld [vmem:[%s3035_s9 + $0x968] sm:$0xff] }
 0x11d   : > { %v509_v43 = vld [vmem:[%s3035_s9 + $0x2d8] sm:$0xff]  ;;  %v1995_v14 = vld [vmem:[%s3035_s9 + $0x748] sm:$0xff] }
 0x11e   : > { %v940_v51 = vadd.f32 %v1973_v35, %v939_v41  ;;  %v889_v7 = vadd.f32 %v1978_v54, %v888_v62  ;;  %v995_v13 = vadd.f32 %v1980_v60, %v994_v3  ;;  %v2060_v35 = vld [vmem:[%s3035_s9 + $0x950] sm:$0xff]  ;;  %v1171_v41 = vadd.f32 %v2056_v20, %v1170_v27  ;;  %v2065_v62 = vld [vmem:[%s3035_s9 + $0x978] sm:$0xff]  ;;  %v1999_v15 = vld [vmem:[%s3035_s9 + $0x768] sm:$0xff] }
 0x11f   : > { %v1225_v56 = vadd.f32 %v2060_v35, %v1224_v42  ;;  %v2052_v3 = vld [vmem:[%s3035_s9 + $0x910] sm:$0xff]  ;;  %v514_v27 = vld [vmem:[%s3035_s9 + $0x300] sm:$0xff] }
 0x120   : > { %v941_v63 = vadd.f32 %v1976_v44, %v940_v51  ;;  %v890_v18 = vadd.f32 %v1981_v21, %v889_v7  ;;  %v996_v26 = vadd.f32 %v1983_v2, %v995_v13  ;;  %v643_v44 = vadd.f32 %v642_v16, %v506_v23  ;;  %v1992_v51 = vld [vmem:[%s3035_s9 + $0x730] sm:$0xff]  ;;  %v1997_v2 = vld [vmem:[%s3035_s9 + $0x758] sm:$0xff]  ;;  %v2058_v16 = vld [vmem:[%s3035_s9 + $0x940] sm:$0xff] }
 0x121   : > { %v591_v21 = vadd.f32 %v590_v37, %v508_v36  ;;  %v512_v7 = vld [vmem:[%s3035_s9 + $0x2f0] sm:$0xff]  ;;  %v2069_v13 = vld [vmem:[%s3035_s9 + $0x998] sm:$0xff]  ;;  %v2071_v23 = vld [vmem:[%s3035_s9 + $0x9a8] sm:$0xff] }
 0x122   : > { %v942_v8 = vadd.f32 %v1979_v55, %v941_v63  ;;  %v891_v32 = vadd.f32 %v1984_v6, %v890_v18  ;;  %v997_v40 = vadd.f32 %v1986_v17, %v996_v26  ;;  %v1172_v55 = vadd.f32 %v2059_v34, %v1171_v41  ;;  %v2066_v63 = vld [vmem:[%s3035_s9 + $0x980] sm:$0xff]  ;;  %v2075_v37 = vld [vmem:[%s3035_s9 + $0x9c8] sm:$0xff] }
 0x123   : > { %v1226_v6 = vadd.f32 %v2063_v50, %v1225_v56  ;;  %v510_v26 = vld [vmem:[%s3035_s9 + $0x2e0] sm:$0xff] }
 0x124   : > { %v943_v19 = vadd.f32 %v1982_v1, %v942_v8  ;;  %v892_v45 = vadd.f32 %v1987_v24, %v891_v32  ;;  %v998_v54 = vadd.f32 %v1989_v31, %v997_v40  ;;  %v695_v1 = vadd.f32 %v694_v30, %v504_v29  ;;  %v2072_v24 = vld [vmem:[%s3035_s9 + $0x9b0] sm:$0xff]  ;;  %v2061_v29 = vld [vmem:[%s3035_s9 + $0x958] sm:$0xff]  ;;  %v515_v32 = vld [vmem:[%s3035_s9 + $0x308] sm:$0xff] }
 0x125   : > { %v1173_v5 = vadd.f32 %v2062_v49, %v1172_v55  ;;  %v644_v8 = vadd.f32 %v643_v44, %v509_v43  ;;  %v1227_v18 = vadd.f32 %v2066_v63, %v1226_v6  ;;  %v2074_v36 = vld [vmem:[%s3035_s9 + $0x9c0] sm:$0xff]  ;;  %v2064_v43 = vld [vmem:[%s3035_s9 + $0x970] sm:$0xff]  ;;  %v2077_v49 = vld [vmem:[%s3035_s9 + $0x9d8] sm:$0xff] }
 0x126   : > { %v944_v33 = vadd.f32 %v1985_v12, %v943_v19  ;;  %v893_v59 = vadd.f32 %v1990_v38, %v892_v45  ;;  %v999_v11 = vadd.f32 %v1992_v51, %v998_v54  ;;  %v2068_v12 = vld [vmem:[%s3035_s9 + $0x990] sm:$0xff]  ;;  %v696_v28 = vadd.f32 %v695_v1, %v507_v57  ;;  %v2002_v40 = vld [vmem:[%s3035_s9 + $0x780] sm:$0xff]  ;;  %v2067_v55 = vld [vmem:[%s3035_s9 + $0x988] sm:$0xff] }
 0x127   : > { %v1174_v17 = vadd.f32 %v2065_v62, %v1173_v5  ;;  %v2000_v19 = vld [vmem:[%s3035_s9 + $0x770] sm:$0xff]  ;;  %v1228_v31 = vadd.f32 %v2069_v13, %v1227_v18  ;;  %v645_v34 = vadd.f32 %v644_v8, %v512_v7  ;;  %v2078_v50 = vld [vmem:[%s3035_s9 + $0x9e0] sm:$0xff]  ;;  %v2001_v1 = vld [vmem:[%s3035_s9 + $0x778] sm:$0xff] }
 0x128   : > { %v945_v46 = vadd.f32 %v1988_v25, %v944_v33  ;;  %v894_v9 = vadd.f32 %v1993_v52, %v893_v59  ;;  %v1276_v25 = vadd.f32 %v2055_v4, %v2052_v3  ;;  %v592_v33 = vadd.f32 %v591_v21, %v511_v0  ;;  %v513_v52 = vld [vmem:[%s3035_s9 + $0x2f8] sm:$0xff]  ;;  %v2080_v63 = vld [vmem:[%s3035_s9 + $0x9f0] sm:$0xff]  ;;  %v2070_v5 = vld [vmem:[%s3035_s9 + $0x9a0] sm:$0xff] }
 0x129   : > { %v1175_v30 = vadd.f32 %v2068_v12, %v1174_v17  ;;  %v1000_v35 = vadd.f32 %v1995_v14, %v999_v11  ;;  %v1229_v45 = vadd.f32 %v2072_v24, %v1228_v31  ;;  %v697_v54 = vadd.f32 %v696_v28, %v510_v26  ;;  %v2081_v0 = vld [vmem:[%s3035_s9 + $0x9f8] sm:$0xff]  ;;  %v2006_v8 = vld [vmem:[%s3035_s9 + $0x7a0] sm:$0xff]  ;;  %v516_v12 = vld [vmem:[%s3035_s9 + $0x310] sm:$0xff] }
 0x12a   : > { %v946_v60 = vadd.f32 %v1991_v39, %v945_v46  ;;  %v895_v20 = vadd.f32 %v1996_v58, %v894_v9  ;;  %v1277_v38 = vadd.f32 %v2058_v16, %v1276_v25  ;;  %v1998_v39 = vld [vmem:[%s3035_s9 + $0x760] sm:$0xff]  ;;  %v2003_v46 = vld [vmem:[%s3035_s9 + $0x788] sm:$0xff]  ;;  %v593_v59 = vadd.f32 %v592_v33, %v514_v27  ;;  %v520_v13 = vld [vmem:[%s3035_s9 + $0x330] sm:$0xff] }
 0x12b   : > { %v1176_v44 = vadd.f32 %v2071_v23, %v1175_v30  ;;  %v1230_v57 = vadd.f32 %v2075_v37, %v1229_v45  ;;  %v518_v58 = vld [vmem:[%s3035_s9 + $0x320] sm:$0xff]  ;;  %v1001_v62 = vadd.f32 %v1998_v39, %v1000_v35  ;;  %v2083_v9 = vld [vmem:[%s3035_s9 + $0xa08] sm:$0xff]  ;;  %v698_v14 = vadd.f32 %v697_v54, %v513_v52  ;;  %v521_v18 = vld [vmem:[%s3035_s9 + $0x338] sm:$0xff] }
 0x12c   : > { %v947_v10 = vadd.f32 %v1994_v53, %v946_v60  ;;  %v896_v41 = vadd.f32 %v1999_v15, %v895_v20  ;;  %v1278_v51 = vadd.f32 %v2061_v29, %v1277_v38  ;;  %v517_v53 = vld [vmem:[%s3035_s9 + $0x318] sm:$0xff]  ;;  %v646_v60 = vadd.f32 %v645_v34, %v515_v32  ;;  %v2086_v23 = vld [vmem:[%s3035_s9 + $0xa20] sm:$0xff]  ;;  %v2087_v24 = vld [vmem:[%s3035_s9 + $0xa28] sm:$0xff] }
 0x12d   : > { %v1177_v56 = vadd.f32 %v2074_v36, %v1176_v44  ;;  %v1231_v7 = vadd.f32 %v2078_v50, %v1230_v57  ;;  %v2073_v15 = vld [vmem:[%s3035_s9 + $0x9b8] sm:$0xff]  ;;  %v2004_v26 = vld [vmem:[%s3035_s9 + $0x790] sm:$0xff]  ;;  %v2090_v35 = vld [vmem:[%s3035_s9 + $0xa40] sm:$0xff]  ;;  %v699_v39 = vadd.f32 %v698_v14, %v516_v12 }
 0x12e   : > { %v948_v22 = vadd.f32 %v1997_v2, %v947_v10  ;;  %v1279_v21 = vadd.f32 %v2064_v43, %v1278_v51  ;;  %v2005_v2 = vld [vmem:[%s3035_s9 + $0x798] sm:$0xff]  ;;  %v897_v3 = vadd.f32 %v2002_v40, %v896_v41  ;;  %v2084_v10 = vld [vmem:[%s3035_s9 + $0xa10] sm:$0xff]  ;;  %v647_v20 = vadd.f32 %v646_v60, %v518_v58  ;;  %v519_v37 = vld [vmem:[%s3035_s9 + $0x328] sm:$0xff] }
 0x12f   : > { %v1178_v6 = vadd.f32 %v2077_v49, %v1177_v56  ;;  %v1232_v17 = vadd.f32 %v2081_v0, %v1231_v7  ;;  %v2008_v27 = vld [vmem:[%s3035_s9 + $0x7b0] sm:$0xff]  ;;  %v2009_v33 = vld [vmem:[%s3035_s9 + $0x7b8] sm:$0xff]  ;;  %v523_v38 = vld [vmem:[%s3035_s9 + $0x348] sm:$0xff] }
 0x130   : > { %v949_v42 = vadd.f32 %v2000_v19, %v948_v22  ;;  %v1280_v11 = vadd.f32 %v2067_v55, %v1279_v21  ;;  %v594_v19 = vadd.f32 %v593_v59, %v517_v53  ;;  %v1002_v22 = vadd.f32 %v2001_v1, %v1001_v62  ;;  %v2076_v30 = vld [vmem:[%s3035_s9 + $0x9d0] sm:$0xff]  ;;  %v2089_v34 = vld [vmem:[%s3035_s9 + $0xa38] sm:$0xff]  ;;  %v2079_v40 = vld [vmem:[%s3035_s9 + $0x9e8] sm:$0xff] }
 0x131   : > { %v1179_v16 = vadd.f32 %v2080_v63, %v1178_v6  ;;  %v898_v28 = vadd.f32 %v2005_v2, %v897_v3  ;;  %v1233_v32 = vadd.f32 %v2084_v10, %v1232_v17  ;;  %v524_v43 = vld [vmem:[%s3035_s9 + $0x350] sm:$0xff]  ;;  %v648_v45 = vadd.f32 %v647_v20, %v521_v18  ;;  %v2093_v50 = vld [vmem:[%s3035_s9 + $0xa58] sm:$0xff]  ;;  %v2007_v52 = vld [vmem:[%s3035_s9 + $0x7a8] sm:$0xff] }
 0x132   : > { %v950_v4 = vadd.f32 %v2003_v46, %v949_v42  ;;  %v1281_v25 = vadd.f32 %v2070_v5, %v1280_v11  ;;  %v595_v44 = vadd.f32 %v594_v19, %v520_v13  ;;  %v1003_v46 = vadd.f32 %v2004_v26, %v1002_v22  ;;  %v2092_v49 = vld [vmem:[%s3035_s9 + $0xa50] sm:$0xff]  ;;  %v2011_v53 = vld [vmem:[%s3035_s9 + $0x7c8] sm:$0xff]  ;;  %v2082_v56 = vld [vmem:[%s3035_s9 + $0xa00] sm:$0xff] }
 0x133   : > { %v1180_v31 = vadd.f32 %v2083_v9, %v1179_v16  ;;  %v1234_v42 = vadd.f32 %v2087_v24, %v1233_v32  ;;  %v899_v54 = vadd.f32 %v2008_v27, %v898_v28  ;;  %v2012_v59 = vld [vmem:[%s3035_s9 + $0x7d0] sm:$0xff]  ;;  %v2095_v60 = vld [vmem:[%s3035_s9 + $0xa68] sm:$0xff]  ;;  %v522_v0 = vld [vmem:[%s3035_s9 + $0x340] sm:$0xff]  ;;  %v700_v1 = vadd.f32 %v699_v39, %v519_v37 }
 0x134   : > { %v951_v29 = vadd.f32 %v2006_v8, %v950_v4  ;;  %v1282_v36 = vadd.f32 %v2073_v15, %v1281_v25  ;;  %v2096_v62 = vld [vmem:[%s3035_s9 + $0xa70] sm:$0xff]  ;;  %v526_v21 = vld [vmem:[%s3035_s9 + $0x360] sm:$0xff]  ;;  %v2085_v2 = vld [vmem:[%s3035_s9 + $0xa18] sm:$0xff]  ;;  %v596_v6 = vadd.f32 %v595_v44, %v523_v38  ;;  %v649_v7 = vadd.f32 %v648_v45, %v524_v43 }
 0x135   : > { %v1181_v41 = vadd.f32 %v2086_v23, %v1180_v31  ;;  %v1235_v58 = vadd.f32 %v2090_v35, %v1234_v42  ;;  %v527_v5 = vld [vmem:[%s3035_s9 + $0x368] sm:$0xff]  ;;  %v1004_v8 = vadd.f32 %v2007_v52, %v1003_v46  ;;  %v2098_v9 = vld [vmem:[%s3035_s9 + $0xa80] sm:$0xff]  ;;  %v900_v14 = vadd.f32 %v2011_v53, %v899_v54  ;;  %v2088_v16 = vld [vmem:[%s3035_s9 + $0xa30] sm:$0xff] }
 0x136   : > { %v1283_v51 = vadd.f32 %v2076_v30, %v1282_v36  ;;  %v952_v55 = vadd.f32 %v2009_v33, %v951_v29  ;;  %v2099_v10 = vld [vmem:[%s3035_s9 + $0xa88] sm:$0xff]  ;;  %v2010_v12 = vld [vmem:[%s3035_s9 + $0x7c0] sm:$0xff]  ;;  %v2101_v20 = vld [vmem:[%s3035_s9 + $0xa98] sm:$0xff]  ;;  %v701_v26 = vadd.f32 %v700_v1, %v522_v0  ;;  %v597_v31 = vadd.f32 %v596_v6, %v526_v21 }
 0x137   : > { %v1182_v57 = vadd.f32 %v2089_v34, %v1181_v41  ;;  %v1236_v4 = vadd.f32 %v2093_v50, %v1235_v58  ;;  %v2014_v13 = vld [vmem:[%s3035_s9 + $0x7e0] sm:$0xff]  ;;  %v2015_v19 = vld [vmem:[%s3035_s9 + $0x7e8] sm:$0xff]  ;;  %v525_v24 = vld [vmem:[%s3035_s9 + $0x358] sm:$0xff]  ;;  %v650_v32 = vadd.f32 %v649_v7, %v527_v5  ;;  %v1005_v33 = vadd.f32 %v2010_v12, %v1004_v8 }
 0x138   : > { %v1284_v63 = vadd.f32 %v2079_v40, %v1283_v51  ;;  %v953_v15 = vadd.f32 %v2012_v59, %v952_v55  ;;  %v2102_v22 = vld [vmem:[%s3035_s9 + $0xaa0] sm:$0xff]  ;;  %v529_v25 = vld [vmem:[%s3035_s9 + $0x378] sm:$0xff]  ;;  %v2091_v27 = vld [vmem:[%s3035_s9 + $0xa48] sm:$0xff]  ;;  %v901_v39 = vadd.f32 %v2014_v13, %v900_v14  ;;  %v702_v52 = vadd.f32 %v701_v26, %v525_v24 }
 0x139   : > { %v1183_v3 = vadd.f32 %v2092_v49, %v1182_v57  ;;  %v1237_v18 = vadd.f32 %v2096_v62, %v1236_v4  ;;  %v530_v30 = vld [vmem:[%s3035_s9 + $0x380] sm:$0xff]  ;;  %v2104_v34 = vld [vmem:[%s3035_s9 + $0xab0] sm:$0xff]  ;;  %v2105_v35 = vld [vmem:[%s3035_s9 + $0xab8] sm:$0xff]  ;;  %v598_v57 = vadd.f32 %v597_v31, %v529_v25 }
 0x13a   : > { %v1285_v11 = vadd.f32 %v2082_v56, %v1284_v63  ;;  %v2013_v37 = vld [vmem:[%s3035_s9 + $0x7d8] sm:$0xff]  ;;  %v954_v40 = vadd.f32 %v2015_v19, %v953_v15  ;;  %v2094_v41 = vld [vmem:[%s3035_s9 + $0xa60] sm:$0xff]  ;;  %v2107_v45 = vld [vmem:[%s3035_s9 + $0xac8] sm:$0xff]  ;;  %v651_v58 = vadd.f32 %v650_v32, %v530_v30 }
 0x13b   : > { %v1184_v17 = vadd.f32 %v2095_v60, %v1183_v3  ;;  %v1238_v29 = vadd.f32 %v2099_v10, %v1237_v18  ;;  %v2017_v38 = vld [vmem:[%s3035_s9 + $0x7f8] sm:$0xff]  ;;  %v2018_v44 = vld [vmem:[%s3035_s9 + $0x800] sm:$0xff]  ;;  %v2108_v46 = vld [vmem:[%s3035_s9 + $0xad0] sm:$0xff]  ;;  %v1006_v59 = vadd.f32 %v2013_v37, %v1005_v33 }
 0x13c   : > { %v1286_v23 = vadd.f32 %v2085_v2, %v1285_v11  ;;  %v528_v50 = vld [vmem:[%s3035_s9 + $0x370] sm:$0xff]  ;;  %v2097_v53 = vld [vmem:[%s3035_s9 + $0xa78] sm:$0xff]  ;;  %v2110_v60 = vld [vmem:[%s3035_s9 + $0xae0] sm:$0xff]  ;;  %v902_v1 = vadd.f32 %v2017_v38, %v901_v39  ;;  %v955_v2 = vadd.f32 %v2018_v44, %v954_v40 }
 0x13d   : > { %v1185_v28 = vadd.f32 %v2098_v9, %v1184_v17  ;;  %v1239_v43 = vadd.f32 %v2102_v22, %v1238_v29  ;;  %v532_v51 = vld [vmem:[%s3035_s9 + $0x390] sm:$0xff]  ;;  %v533_v56 = vld [vmem:[%s3035_s9 + $0x398] sm:$0xff]  ;;  %v2111_v62 = vld [vmem:[%s3035_s9 + $0xae8] sm:$0xff]  ;;  %v703_v12 = vadd.f32 %v702_v52, %v528_v50 }
 0x13e   : > { %v1287_v36 = vadd.f32 %v2088_v16, %v1286_v23  ;;  %v2016_v0 = vld [vmem:[%s3035_s9 + $0x7f0] sm:$0xff]  ;;  %v2021_v6 = vld [vmem:[%s3035_s9 + $0x818] sm:$0xff]  ;;  %v2114_v8 = vld [vmem:[%s3035_s9 + $0xb00] sm:$0xff]  ;;  %v599_v17 = vadd.f32 %v598_v57, %v532_v51  ;;  %v652_v18 = vadd.f32 %v651_v58, %v533_v56 }
 0x13f   : > { %v1186_v42 = vadd.f32 %v2101_v20, %v1185_v28  ;;  %v1240_v55 = vadd.f32 %v2105_v35, %v1239_v43  ;;  %v2020_v21 = vld [vmem:[%s3035_s9 + $0x810] sm:$0xff]  ;;  %v2113_v7 = vld [vmem:[%s3035_s9 + $0xaf8] sm:$0xff]  ;;  %v531_v10 = vld [vmem:[%s3035_s9 + $0x388] sm:$0xff]  ;;  %v1007_v19 = vadd.f32 %v2016_v0, %v1006_v59 }
 0x140   : > { %v1288_v49 = vadd.f32 %v2091_v27, %v1287_v36  ;;  %v2100_v3 = vld [vmem:[%s3035_s9 + $0xa90] sm:$0xff]  ;;  %v535_v11 = vld [vmem:[%s3035_s9 + $0x3a8] sm:$0xff]  ;;  %v2117_v22 = vld [vmem:[%s3035_s9 + $0xb18] sm:$0xff]  ;;  %v903_v26 = vadd.f32 %v2020_v21, %v902_v1  ;;  %v956_v27 = vadd.f32 %v2021_v6, %v955_v2  ;;  %v704_v37 = vadd.f32 %v703_v12, %v531_v10 }
 0x141   : > { %v1187_v54 = vadd.f32 %v2104_v34, %v1186_v42  ;;  %v1241_v5 = vadd.f32 %v2108_v46, %v1240_v55  ;;  %v2103_v13 = vld [vmem:[%s3035_s9 + $0xaa8] sm:$0xff]  ;;  %v536_v16 = vld [vmem:[%s3035_s9 + $0x3b0] sm:$0xff]  ;;  %v2106_v28 = vld [vmem:[%s3035_s9 + $0xac0] sm:$0xff]  ;;  %v600_v42 = vadd.f32 %v599_v17, %v535_v11 }
 0x142   : > { %v1289_v63 = vadd.f32 %v2094_v41, %v1288_v49  ;;  %v2116_v20 = vld [vmem:[%s3035_s9 + $0xb10] sm:$0xff]  ;;  %v2019_v24 = vld [vmem:[%s3035_s9 + $0x808] sm:$0xff]  ;;  %v534_v35 = vld [vmem:[%s3035_s9 + $0x3a0] sm:$0xff]  ;;  %v653_v43 = vadd.f32 %v652_v18, %v536_v16 }
 0x143   : > { %v1188_v4 = vadd.f32 %v2107_v45, %v1187_v54  ;;  %v1242_v15 = vadd.f32 %v2111_v62, %v1241_v5  ;;  %v2023_v25 = vld [vmem:[%s3035_s9 + $0x828] sm:$0xff]  ;;  %v2024_v31 = vld [vmem:[%s3035_s9 + $0x830] sm:$0xff]  ;;  %v538_v36 = vld [vmem:[%s3035_s9 + $0x3c0] sm:$0xff]  ;;  %v1008_v44 = vadd.f32 %v2019_v24, %v1007_v19  ;;  %v705_v0 = vadd.f32 %v704_v37, %v534_v35 }
 0x144   : > { %v1290_v9 = vadd.f32 %v2097_v53, %v1289_v63  ;;  %v2119_v32 = vld [vmem:[%s3035_s9 + $0xb28] sm:$0xff]  ;;  %v2120_v33 = vld [vmem:[%s3035_s9 + $0xb30] sm:$0xff]  ;;  %v2109_v38 = vld [vmem:[%s3035_s9 + $0xad8] sm:$0xff]  ;;  %v904_v52 = vadd.f32 %v2023_v25, %v903_v26  ;;  %v957_v53 = vadd.f32 %v2024_v31, %v956_v27 }
 0x145   : > { %v1189_v14 = vadd.f32 %v2110_v60, %v1188_v4  ;;  %v1243_v30 = vadd.f32 %v2114_v8, %v1242_v15  ;;  %v539_v41 = vld [vmem:[%s3035_s9 + $0x3c8] sm:$0xff]  ;;  %v2122_v45 = vld [vmem:[%s3035_s9 + $0xb40] sm:$0xff]  ;;  %v2112_v54 = vld [vmem:[%s3035_s9 + $0xaf0] sm:$0xff]  ;;  %v601_v4 = vadd.f32 %v600_v42, %v538_v36 }
 0x146   : > { %v1291_v23 = vadd.f32 %v2100_v3, %v1290_v9  ;;  %v2123_v46 = vld [vmem:[%s3035_s9 + $0xb48] sm:$0xff]  ;;  %v2022_v50 = vld [vmem:[%s3035_s9 + $0x820] sm:$0xff]  ;;  %v2125_v58 = vld [vmem:[%s3035_s9 + $0xb58] sm:$0xff]  ;;  %v654_v5 = vadd.f32 %v653_v43, %v539_v41 }
 0x147   : > { %v1190_v29 = vadd.f32 %v2113_v7, %v1189_v14  ;;  %v1244_v40 = vadd.f32 %v2117_v22, %v1243_v30  ;;  %v2026_v51 = vld [vmem:[%s3035_s9 + $0x840] sm:$0xff]  ;;  %v2027_v57 = vld [vmem:[%s3035_s9 + $0x848] sm:$0xff]  ;;  %v537_v62 = vld [vmem:[%s3035_s9 + $0x3b8] sm:$0xff]  ;;  %v1009_v6 = vadd.f32 %v2022_v50, %v1008_v44 }
 0x148   : > { %v1292_v34 = vadd.f32 %v2103_v13, %v1291_v23  ;;  %v2126_v59 = vld [vmem:[%s3035_s9 + $0xb60] sm:$0xff]  ;;  %v541_v63 = vld [vmem:[%s3035_s9 + $0x3d8] sm:$0xff]  ;;  %v2115_v21 = vld [vmem:[%s3035_s9 + $0xb08] sm:$0xff]  ;;  %v905_v12 = vadd.f32 %v2026_v51, %v904_v52  ;;  %v958_v13 = vadd.f32 %v2027_v57, %v957_v53  ;;  %v706_v24 = vadd.f32 %v705_v0, %v537_v62 }
 0x149   : > { %v1191_v39 = vadd.f32 %v2116_v20, %v1190_v29  ;;  %v1245_v56 = vadd.f32 %v2120_v33, %v1244_v40  ;;  %v542_v3 = vld [vmem:[%s3035_s9 + $0x3e0] sm:$0xff]  ;;  %v2128_v7 = vld [vmem:[%s3035_s9 + $0xb70] sm:$0xff]  ;;  %v2129_v8 = vld [vmem:[%s3035_s9 + $0xb78] sm:$0xff]  ;;  %v602_v29 = vadd.f32 %v601_v4, %v541_v63 }
 0x14a   : > { %v1293_v49 = vadd.f32 %v2106_v28, %v1292_v34  ;;  %v2025_v10 = vld [vmem:[%s3035_s9 + $0x838] sm:$0xff]  ;;  %v2118_v14 = vld [vmem:[%s3035_s9 + $0xb20] sm:$0xff]  ;;  %v2131_v18 = vld [vmem:[%s3035_s9 + $0xb88] sm:$0xff]  ;;  %v655_v30 = vadd.f32 %v654_v5, %v542_v3 }
 0x14b   : > { %v1192_v55 = vadd.f32 %v2119_v32, %v1191_v39  ;;  %v1246_v2 = vadd.f32 %v2123_v46, %v1245_v56  ;;  %v2029_v11 = vld [vmem:[%s3035_s9 + $0x858] sm:$0xff]  ;;  %v2030_v17 = vld [vmem:[%s3035_s9 + $0x860] sm:$0xff]  ;;  %v2132_v19 = vld [vmem:[%s3035_s9 + $0xb90] sm:$0xff]  ;;  %v1010_v31 = vadd.f32 %v2025_v10, %v1009_v6 }
 0x14c   : > { %v1294_v60 = vadd.f32 %v2109_v38, %v1293_v49  ;;  %v540_v22 = vld [vmem:[%s3035_s9 + $0x3d0] sm:$0xff]  ;;  %v2121_v25 = vld [vmem:[%s3035_s9 + $0xb38] sm:$0xff]  ;;  %v2134_v32 = vld [vmem:[%s3035_s9 + $0xba0] sm:$0xff]  ;;  %v906_v37 = vadd.f32 %v2029_v11, %v905_v12  ;;  %v959_v38 = vadd.f32 %v2030_v17, %v958_v13 }
 0x14d   : > { %v1193_v1 = vadd.f32 %v2122_v45, %v1192_v55  ;;  %v1247_v16 = vadd.f32 %v2126_v59, %v1246_v2  ;;  %v544_v23 = vld [vmem:[%s3035_s9 + $0x3f0] sm:$0xff]  ;;  %v545_v28 = vld [vmem:[%s3035_s9 + $0x3f8] sm:$0xff]  ;;  %v2135_v33 = vld [vmem:[%s3035_s9 + $0xba8] sm:$0xff]  ;;  %v707_v50 = vadd.f32 %v706_v24, %v540_v22 }
 0x14e   : > { %v1295_v9 = vadd.f32 %v2112_v54, %v1294_v60  ;;  %v2028_v35 = vld [vmem:[%s3035_s9 + $0x850] sm:$0xff]  ;;  %v2033_v42 = vld [vmem:[%s3035_s9 + $0x878] sm:$0xff]  ;;  %v2138_v44 = vld [vmem:[%s3035_s9 + $0xbc0] sm:$0xff]  ;;  %v603_v55 = vadd.f32 %v602_v29, %v544_v23  ;;  %v656_v56 = vadd.f32 %v655_v30, %v545_v28 }
 0x14f   : > { %v1194_v15 = vadd.f32 %v2125_v58, %v1193_v1  ;;  %v1248_v27 = vadd.f32 %v2129_v8, %v1247_v16  ;;  %v2032_v36 = vld [vmem:[%s3035_s9 + $0x870] sm:$0xff]  ;;  %v2137_v43 = vld [vmem:[%s3035_s9 + $0xbb8] sm:$0xff]  ;;  %v543_v46 = vld [vmem:[%s3035_s9 + $0x3e8] sm:$0xff]  ;;  %v1011_v57 = vadd.f32 %v2028_v35, %v1010_v31 }
 0x150   : > { %v1296_v20 = vadd.f32 %v2115_v21, %v1295_v9  ;;  %v2124_v39 = vld [vmem:[%s3035_s9 + $0xb50] sm:$0xff]  ;;  %v547_v49 = vld [vmem:[%s3035_s9 + $0x408] sm:$0xff]  ;;  %v2141_v59 = vld [vmem:[%s3035_s9 + $0xbd8] sm:$0xff]  ;;  %v907_v0 = vadd.f32 %v2032_v36, %v906_v37  ;;  %v960_v21 = vadd.f32 %v2033_v42, %v959_v38  ;;  %v708_v10 = vadd.f32 %v707_v50, %v543_v46 }
 0x151   : > { %v1195_v26 = vadd.f32 %v2128_v7, %v1194_v15  ;;  %v1249_v41 = vadd.f32 %v2132_v19, %v1248_v27  ;;  %v2127_v51 = vld [vmem:[%s3035_s9 + $0xb68] sm:$0xff]  ;;  %v548_v54 = vld [vmem:[%s3035_s9 + $0x410] sm:$0xff]  ;;  %v2130_v1 = vld [vmem:[%s3035_s9 + $0xb80] sm:$0xff]  ;;  %v604_v15 = vadd.f32 %v603_v55, %v547_v49 }
 0x152   : > { %v1297_v34 = vadd.f32 %v2118_v14, %v1296_v20  ;;  %v2140_v58 = vld [vmem:[%s3035_s9 + $0xbd0] sm:$0xff]  ;;  %v2031_v62 = vld [vmem:[%s3035_s9 + $0x868] sm:$0xff]  ;;  %v546_v8 = vld [vmem:[%s3035_s9 + $0x400] sm:$0xff]  ;;  %v657_v16 = vadd.f32 %v656_v56, %v548_v54 }
 0x153   : > { %v1196_v40 = vadd.f32 %v2131_v18, %v1195_v26  ;;  %v1250_v53 = vadd.f32 %v2135_v33, %v1249_v41  ;;  %v2035_v63 = vld [vmem:[%s3035_s9 + $0x888] sm:$0xff]  ;;  %v2036_v4 = vld [vmem:[%s3035_s9 + $0x890] sm:$0xff]  ;;  %v550_v9 = vld [vmem:[%s3035_s9 + $0x420] sm:$0xff]  ;;  %v1012_v17 = vadd.f32 %v2031_v62, %v1011_v57  ;;  %v709_v35 = vadd.f32 %v708_v10, %v546_v8 }
 0x154   : > { %v1298_v45 = vadd.f32 %v2121_v25, %v1297_v34  ;;  %v2143_v5 = vld [vmem:[%s3035_s9 + $0xbe8] sm:$0xff]  ;;  %v2144_v6 = vld [vmem:[%s3035_s9 + $0xbf0] sm:$0xff]  ;;  %v2133_v11 = vld [vmem:[%s3035_s9 + $0xb98] sm:$0xff]  ;;  %v908_v24 = vadd.f32 %v2035_v63, %v907_v0  ;;  %v961_v25 = vadd.f32 %v2036_v4, %v960_v21 }
 0x155   : > { %v1197_v52 = vadd.f32 %v2134_v32, %v1196_v40  ;;  %v1251_v3 = vadd.f32 %v2138_v44, %v1250_v53  ;;  %v551_v14 = vld [vmem:[%s3035_s9 + $0x428] sm:$0xff]  ;;  %v2146_v18 = vld [vmem:[%s3035_s9 + $0xc00] sm:$0xff]  ;;  %v2136_v26 = vld [vmem:[%s3035_s9 + $0xbb0] sm:$0xff]  ;;  %v605_v40 = vadd.f32 %v604_v15, %v550_v9 }
 0x156   : > { %v1299_v60 = vadd.f32 %v2124_v39, %v1298_v45  ;;  %v2147_v19 = vld [vmem:[%s3035_s9 + $0xc08] sm:$0xff]  ;;  %v2034_v22 = vld [vmem:[%s3035_s9 + $0x880] sm:$0xff]  ;;  %v2149_v30 = vld [vmem:[%s3035_s9 + $0xc18] sm:$0xff]  ;;  %v658_v41 = vadd.f32 %v657_v16, %v551_v14 }
 0x157   : > { %v1198_v2 = vadd.f32 %v2137_v43, %v1197_v52  ;;  %v1252_v13 = vadd.f32 %v2141_v59, %v1251_v3  ;;  %v2038_v23 = vld [vmem:[%s3035_s9 + $0x8a0] sm:$0xff]  ;;  %v2039_v29 = vld [vmem:[%s3035_s9 + $0x8a8] sm:$0xff]  ;;  %v549_v33 = vld [vmem:[%s3035_s9 + $0x418] sm:$0xff]  ;;  %v1013_v42 = vadd.f32 %v2034_v22, %v1012_v17 }
 0x158   : > { %v1300_v7 = vadd.f32 %v2127_v51, %v1299_v60  ;;  %v2150_v31 = vld [vmem:[%s3035_s9 + $0xc20] sm:$0xff]  ;;  %v553_v34 = vld [vmem:[%s3035_s9 + $0x438] sm:$0xff]  ;;  %v2139_v36 = vld [vmem:[%s3035_s9 + $0xbc8] sm:$0xff]  ;;  %v909_v50 = vadd.f32 %v2038_v23, %v908_v24  ;;  %v962_v51 = vadd.f32 %v2039_v29, %v961_v25  ;;  %v710_v62 = vadd.f32 %v709_v35, %v549_v33 }
 0x159   : > { %v1199_v12 = vadd.f32 %v2140_v58, %v1198_v2  ;;  %v1253_v28 = vadd.f32 %v2144_v6, %v1252_v13  ;;  %v554_v39 = vld [vmem:[%s3035_s9 + $0x440] sm:$0xff]  ;;  %v2152_v43 = vld [vmem:[%s3035_s9 + $0xc30] sm:$0xff]  ;;  %v2153_v44 = vld [vmem:[%s3035_s9 + $0xc38] sm:$0xff]  ;;  %v606_v2 = vadd.f32 %v605_v40, %v553_v34 }
 0x15a   : > { %v1301_v20 = vadd.f32 %v2130_v1, %v1300_v7  ;;  %v2037_v46 = vld [vmem:[%s3035_s9 + $0x898] sm:$0xff]  ;;  %v2142_v52 = vld [vmem:[%s3035_s9 + $0xbe0] sm:$0xff]  ;;  %v2155_v56 = vld [vmem:[%s3035_s9 + $0xc48] sm:$0xff]  ;;  %v659_v3 = vadd.f32 %v658_v41, %v554_v39 }
 0x15b   : > { %v1200_v27 = vadd.f32 %v2143_v5, %v1199_v12  ;;  %v1254_v38 = vadd.f32 %v2147_v19, %v1253_v28  ;;  %v2041_v49 = vld [vmem:[%s3035_s9 + $0x8b8] sm:$0xff]  ;;  %v2042_v55 = vld [vmem:[%s3035_s9 + $0x8c0] sm:$0xff]  ;;  %v2156_v57 = vld [vmem:[%s3035_s9 + $0xc50] sm:$0xff]  ;;  %v1014_v4 = vadd.f32 %v2037_v46, %v1013_v42 }
 0x15c   : > { %v1302_v32 = vadd.f32 %v2133_v11, %v1301_v20  ;;  %v552_v59 = vld [vmem:[%s3035_s9 + $0x430] sm:$0xff]  ;;  %v2145_v63 = vld [vmem:[%s3035_s9 + $0xbf8] sm:$0xff]  ;;  %v2158_v5 = vld [vmem:[%s3035_s9 + $0xc60] sm:$0xff]  ;;  %v910_v10 = vadd.f32 %v2041_v49, %v909_v50  ;;  %v963_v11 = vadd.f32 %v2042_v55, %v962_v51 }
 0x15d   : > { %v1201_v37 = vadd.f32 %v2146_v18, %v1200_v27  ;;  %v1255_v54 = vadd.f32 %v2150_v31, %v1254_v38  ;;  %v556_v60 = vld [vmem:[%s3035_s9 + $0x450] sm:$0xff]  ;;  %v557_v1 = vld [vmem:[%s3035_s9 + $0x458] sm:$0xff]  ;;  %v2159_v6 = vld [vmem:[%s3035_s9 + $0xc68] sm:$0xff]  ;;  %v711_v22 = vadd.f32 %v710_v62, %v552_v59 }
 0x15e   : > { %v1303_v45 = vadd.f32 %v2136_v26, %v1302_v32  ;;  %v2040_v8 = vld [vmem:[%s3035_s9 + $0x8b0] sm:$0xff]  ;;  %v2045_v15 = vld [vmem:[%s3035_s9 + $0x8d8] sm:$0xff]  ;;  %v2162_v17 = vld [vmem:[%s3035_s9 + $0xc80] sm:$0xff]  ;;  %v607_v27 = vadd.f32 %v606_v2, %v556_v60  ;;  %v660_v28 = vadd.f32 %v659_v3, %v557_v1 }
 0x15f   : > { %v1202_v53 = vadd.f32 %v2149_v30, %v1201_v37  ;;  %v1256_v21 = vadd.f32 %v2153_v44, %v1255_v54  ;;  %v2044_v9 = vld [vmem:[%s3035_s9 + $0x8d0] sm:$0xff]  ;;  %v2161_v16 = vld [vmem:[%s3035_s9 + $0xc78] sm:$0xff]  ;;  %v555_v19 = vld [vmem:[%s3035_s9 + $0x448] sm:$0xff]  ;;  %v1015_v29 = vadd.f32 %v2040_v8, %v1014_v4 }
 0x160   : > { %v1304_v58 = vadd.f32 %v2139_v36, %v1303_v45  ;;  %v2148_v12 = vld [vmem:[%s3035_s9 + $0xc10] sm:$0xff]  ;;  %v559_v20 = vld [vmem:[%s3035_s9 + $0x468] sm:$0xff]  ;;  %v2165_v31 = vld [vmem:[%s3035_s9 + $0xc98] sm:$0xff]  ;;  %v911_v35 = vadd.f32 %v2044_v9, %v910_v10  ;;  %v964_v36 = vadd.f32 %v2045_v15, %v963_v11  ;;  %v712_v44 = vadd.f32 %v711_v22, %v555_v19 }
 0x161   : > { %v1203_v0 = vadd.f32 %v2152_v43, %v1202_v53  ;;  %v1257_v14 = vadd.f32 %v2156_v57, %v1256_v21  ;;  %v2151_v23 = vld [vmem:[%s3035_s9 + $0xc28] sm:$0xff]  ;;  %v560_v26 = vld [vmem:[%s3035_s9 + $0x470] sm:$0xff]  ;;  %v2154_v37 = vld [vmem:[%s3035_s9 + $0xc40] sm:$0xff]  ;;  %v608_v51 = vadd.f32 %v607_v27, %v559_v20 }
 0x162   : > { %v1305_v7 = vadd.f32 %v2142_v52, %v1304_v58  ;;  %v2164_v30 = vld [vmem:[%s3035_s9 + $0xc90] sm:$0xff]  ;;  %v2043_v33 = vld [vmem:[%s3035_s9 + $0x8c8] sm:$0xff]  ;;  %v2157_v45 = vld [vmem:[%s3035_s9 + $0xc58] sm:$0xff]  ;;  %v661_v52 = vadd.f32 %v660_v28, %v560_v26 }
 0x163   : > { %v1204_v13 = vadd.f32 %v2155_v56, %v1203_v0  ;;  %v1258_v25 = vadd.f32 %v2159_v6, %v1257_v14  ;;  %v2047_v34 = vld [vmem:[%s3035_s9 + $0x8e8] sm:$0xff]  ;;  %v2048_v40 = vld [vmem:[%s3035_s9 + $0x8f0] sm:$0xff]  ;;  %v558_v50 = vld [vmem:[%s3035_s9 + $0x460] sm:$0xff]  ;;  %v1016_v53 = vadd.f32 %v2043_v33, %v1015_v29 }
 0x164   : > { %v1306_v18 = vadd.f32 %v2145_v63, %v1305_v7  ;;  %v2167_v41 = vld [vmem:[%s3035_s9 + $0xca8] sm:$0xff]  ;;  %v2168_v42 = vld [vmem:[%s3035_s9 + $0xcb0] sm:$0xff]  ;;  %v2170_v54 = vld [vmem:[%s3035_s9 + $0xcc0] sm:$0xff]  ;;  %v912_v58 = vadd.f32 %v2047_v34, %v911_v35  ;;  %v965_v59 = vadd.f32 %v2048_v40, %v964_v36  ;;  %v713_v2 = vadd.f32 %v712_v44, %v558_v50 }
 0x165   : > { %v1205_v24 = vadd.f32 %v2158_v5, %v1204_v13  ;;  %v1259_v39 = vadd.f32 %v2162_v17, %v1258_v25  ;;  %v2171_v55 = vld [vmem:[%s3035_s9 + $0xcc8] sm:$0xff]  ;;  %v2046_v57 = vld [vmem:[%s3035_s9 + $0x8e0] sm:$0xff]  ;;  %v2160_v60 = vld [vmem:[%s3035_s9 + $0xc70] sm:$0xff]  ;;  %v609_v7 = vrot.slane %v608_v51, 4  ;;  %v662_v8 = vrot.slane %v661_v52, 4 }
 0x166   : > { %v1307_v32 = vadd.f32 %v2148_v12, %v1306_v18  ;;  %v2173_v0 = vld [vmem:[%s3035_s9 + $0xcd8] sm:$0xff]  ;;  %v2174_v21 = vld [vmem:[%s3035_s9 + $0xce0] sm:$0xff]  ;;  %v2163_v3 = vld [vmem:[%s3035_s9 + $0xc88] sm:$0xff]  ;;  %v1017_v9 = vadd.f32 %v2046_v57, %v1016_v53  ;;  %v913_v14 = vrot.slane %v912_v58, 4  ;;  %v966_v15 = vrot.slane %v965_v59, 4 }
 0x167   : > { %v1206_v38 = vadd.f32 %v2161_v16, %v1205_v24  ;;  %v1260_v49 = vadd.f32 %v2165_v31, %v1259_v39  ;;  %v561_v6 = vld [vmem:[%s3035_s9 + $0x478] sm:$0xff]  ;;  %v2176_v10 = vld [vmem:[%s3035_s9 + $0xcf0] sm:$0xff]  ;;  %v2166_v16 = vld [vmem:[%s3035_s9 + $0xca0] sm:$0xff]  ;;  %v610_v27 = vadd.f32 %v609_v7, %v608_v51  ;;  %v663_v28 = vadd.f32 %v662_v8, %v661_v52 }
 0x168   : > { %v1308_v43 = vadd.f32 %v2151_v23, %v1307_v32  ;;  %v2177_v11 = vld [vmem:[%s3035_s9 + $0xcf8] sm:$0xff]  ;;  %v2179_v19 = vld [vmem:[%s3035_s9 + $0xd08] sm:$0xff]  ;;  %v2180_v20 = vld [vmem:[%s3035_s9 + $0xd10] sm:$0xff]  ;;  %v714_v23 = vadd.f32 %v713_v2, %v561_v6  ;;  %v914_v33 = vadd.f32 %v913_v14, %v912_v58  ;;  %v967_v34 = vadd.f32 %v966_v15, %v965_v59 }
 0x169   : > { %v1207_v46 = vadd.f32 %v2164_v30, %v1206_v38  ;;  %v1261_v63 = vadd.f32 %v2168_v42, %v1260_v49  ;;  %v2049_v13 = vld [vmem:[%s3035_s9 + $0x8f8] sm:$0xff]  ;;  %v2182_v30 = vld [vmem:[%s3035_s9 + $0xd20] sm:$0xff]  ;;  %v2183_v31 = vld [vmem:[%s3035_s9 + $0xd28] sm:$0xff] }
 0x16a   : > { %v1309_v56 = vadd.f32 %v2154_v37, %v1308_v43  ;;  %v2169_v24 = vld [vmem:[%s3035_s9 + $0xcb8] sm:$0xff]  ;;  %v1018_v29 = vadd.f32 %v2049_v13, %v1017_v9  ;;  %v2172_v35 = vld [vmem:[%s3035_s9 + $0xcd0] sm:$0xff]  ;;  %v2186_v39 = vld [vmem:[%s3035_s9 + $0xd40] sm:$0xff]  ;;  %v915_v53 = vrot.slane %v914_v33, 2 }
 0x16b   : > { %v1208_v62 = vadd.f32 %v2167_v41, %v1207_v46  ;;  %v1262_v5 = vadd.f32 %v2171_v55, %v1261_v63  ;;  %v2185_v38 = vld [vmem:[%s3035_s9 + $0xd38] sm:$0xff]  ;;  %v715_v41 = vrot.slane %v714_v23, 4  ;;  %v2175_v42 = vld [vmem:[%s3035_s9 + $0xce8] sm:$0xff]  ;;  %v664_v46 = vrot.slane %v663_v28, 2  ;;  %v2188_v50 = vld [vmem:[%s3035_s9 + $0xd50] sm:$0xff] }
 0x16c   : > { %v1310_v1 = vadd.f32 %v2157_v45, %v1309_v56  ;;  %v611_v45 = vrot.slane %v610_v27, 2  ;;  %v1019_v49 = vrot.slane %v1018_v29, 4  ;;  %v2189_v51 = vld [vmem:[%s3035_s9 + $0xd58] sm:$0xff]  ;;  %v2178_v55 = vld [vmem:[%s3035_s9 + $0xd00] sm:$0xff]  ;;  %v2191_v58 = vld [vmem:[%s3035_s9 + $0xd68] sm:$0xff] }
 0x16d   : > { %v1209_v4 = vadd.f32 %v2170_v54, %v1208_v62  ;;  %v1263_v18 = vadd.f32 %v2174_v21, %v1262_v5  ;;  %v968_v54 = vrot.slane %v967_v34, 2  ;;  %v2192_v59 = vld [vmem:[%s3035_s9 + $0xd70] sm:$0xff]  ;;  %v716_v62 = vadd.f32 %v715_v41, %v714_v23  ;;  %v2181_v63 = vld [vmem:[%s3035_s9 + $0xd18] sm:$0xff] }
 0x16e   : > { %v1311_v12 = vadd.f32 %v2160_v60, %v1310_v1  ;;  %v612_v1 = vadd.f32 %v611_v45, %v610_v27  ;;  %v665_v2 = vadd.f32 %v664_v46, %v663_v28  ;;  %v916_v5 = vadd.f32 %v915_v53, %v914_v33  ;;  %v2184_v7 = vld [vmem:[%s3035_s9 + $0xd30] sm:$0xff]  ;;  %v2193_v27 = vld [vmem:[%s3035_s9 + $0xd78] sm:$0xff] }
 0x16f   : > { %v1210_v17 = vadd.f32 %v2173_v0, %v1209_v4  ;;  %v1264_v26 = vadd.f32 %v2177_v11, %v1263_v18  ;;  %v969_v6 = vadd.f32 %v968_v54, %v967_v34  ;;  %v717_v11 = vrot.slane %v716_v62, 2 }
 0x170   : > { %v1312_v22 = vadd.f32 %v2163_v3, %v1311_v12  ;;  %v1020_v3 = vadd.f32 %v1019_v49, %v1018_v29  ;;  %v2187_v12 = vld [vmem:[%s3035_s9 + $0xd48] sm:$0xff]  ;;  %v613_v15 = vrot.slane %v612_v1, 1 }
 0x171   : > { %v1211_v25 = vadd.f32 %v2176_v10, %v1210_v17  ;;  %v1265_v37 = vadd.f32 %v2180_v20, %v1264_v26  ;;  %v970_v20 = vrot.slane %v969_v6, 1  ;;  %v718_v26 = vadd.f32 %v717_v11, %v716_v62 }
 0x172   : > { %v1313_v32 = vadd.f32 %v2166_v16, %v1312_v22  ;;  %v666_v16 = vrot.slane %v665_v2, 1  ;;  %v1021_v17 = vrot.slane %v1020_v3, 2  ;;  %v2190_v22 = vld [vmem:[%s3035_s9 + $0xd60] sm:$0xff] }
 0x173   : > { %v1212_v36 = vadd.f32 %v2179_v19, %v1211_v25  ;;  %v1266_v44 = vadd.f32 %v2183_v31, %v1265_v37  ;;  %v917_v19 = vrot.slane %v916_v5, 1  ;;  %v719_v41 = vrot.slane %v718_v26, 1 }
 0x174   : > { %v1314_v40 = vadd.f32 %v2169_v24, %v1313_v32  ;;  %v667_v31 = vadd.f32 %v666_v16, %v665_v2  ;;  %v1022_v32 = vadd.f32 %v1021_v17, %v1020_v3 }
 0x175   : > { %v1213_v43 = vadd.f32 %v2182_v30, %v1212_v36  ;;  %v1267_v57 = vadd.f32 %v2186_v39, %v1266_v44  ;;  %v614_v30 = vadd.f32 %v613_v15, %v612_v1  ;;  %v918_v34 = vadd.f32 %v917_v19, %v916_v5 }
 0x176   : > { %v1315_v52 = vadd.f32 %v2172_v35, %v1314_v40  ;;  %v971_v35 = vadd.f32 %v970_v20, %v969_v6  ;;  %v720_v54 = vadd.f32 %v719_v41, %v718_v26 }
 0x177   : > { %v1214_v56 = vadd.f32 %v2185_v38, %v1213_v43  ;;  %v1268_v21 = vadd.f32 %v2189_v51, %v1267_v57  ;;  %v1330_v46 = vsel %vm1329_vm2, %v614_v30, %v918_v34  ;;  %v1358_v30 = vld [vmem:[#allocation9] sm:$0xf] }
 0x178   : > { %v1316_v60 = vadd.f32 %v2175_v42, %v1315_v52  ;;  %v1023_v42 = vrot.slane %v1022_v32, 1  ;;  %v1331_v49 = vsel %vm1329_vm2, %v667_v31, %v971_v35 }
 0x179   : > { %v1215_v0 = vadd.f32 %v2188_v50, %v1214_v56  ;;  %v1269_v9 = vadd.f32 %v2192_v59, %v1268_v21 }
 0x17a   : > { %v1317_v4 = vadd.f32 %v2178_v55, %v1316_v60  ;;  %v1024_v55 = vadd.f32 %v1023_v42, %v1022_v32 }
 0x17b   : > { %v1216_v8 = vadd.f32 %v2191_v58, %v1215_v0  ;;  %v1270_v14 = vrot.slane %v1269_v9, 4 }
 0x17c   : > { %v1318_v10 = vadd.f32 %v2181_v63, %v1317_v4  ;;  %v1332_v60 = vsel %vm1329_vm2, %v720_v54, %v1024_v55 }
 0x17d   : > { %v1217_v13 = vrot.slane %v1216_v8, 4  ;;  %v1271_v24 = vadd.f32 %v1270_v14, %v1269_v9  ;;  %v1707_v14 = vld [vmem:[#allocation12] sm:$0x1] }
 0x17e   : > { %v1319_v18 = vadd.f32 %v2184_v7, %v1318_v10 }
 0x17f   : > { %v1218_v23 = vadd.f32 %v1217_v13, %v1216_v8  ;;  %v1272_v29 = vrot.slane %v1271_v24, 2 }
 0x180   : > { %v1320_v25 = vadd.f32 %v2187_v12, %v1319_v18  ;;  %v1705_v12 = vstv %s1393_s22  ;;  %v1346_v18 = vld [vmem:[#allocation6] sm:$0x7] }
 0x181   : > { %v1219_v28 = vrot.slane %v1218_v23, 2  ;;  %v1273_v37 = vadd.f32 %v1272_v29, %v1271_v24  ;;  %v1356_v29 = vld [vmem:[#allocation8] sm:$0x1] }
 0x182   : > { %v1321_v33 = vadd.f32 %v2190_v22, %v1320_v25 }
 0x183   : > { %v1220_v36 = vadd.f32 %v1219_v28, %v1218_v23  ;;  %v1274_v40 = vrot.slane %v1273_v37, 1 }
 0x184   : > { %v1322_v38 = vadd.f32 %v2193_v27, %v1321_v33  ;;  %v1359_v33 = vmax.f32 %v1358_v30, 0.0 }
 0x185   : > { %v1221_v39 = vrot.slane %v1220_v36, 1  ;;  %v1275_v45 = vadd.f32 %v1274_v40, %v1273_v37 }
 0x186   : > { %v1323_v43 = vrot.slane %v1322_v38, 4 }
 0x187   : > { %v1222_v44 = vadd.f32 %v1221_v39, %v1220_v36  ;;  %v1335_v53 = vsel %vm1333_vm3, %v1331_v49, %v1275_v45 }
 0x188   : > { %v1324_v50 = vadd.f32 %v1323_v43, %v1322_v38  ;;  %v1339_v58 = vsel %vm1337_vm4, %v1335_v53, 0.0 }
 0x189   : > { %v1334_v52 = vsel %vm1333_vm3, %v1330_v46, %v1222_v44 }
 0x18a   : > { %v1325_v51 = vrot.slane %v1324_v50, 2  ;;  %v1338_v57 = vsel %vm1337_vm4, %v1334_v52, 0.0 }
 0x18b   : > { %v1340_v63 = vadd.f32 %v1339_v58, %v1338_v57 }
 0x18c   : > { %v1326_v56 = vadd.f32 %v1325_v51, %v1324_v50 }
 0x18e   : > { %v1327_v59 = vrot.slane %v1326_v56, 1 }
 0x190   : > { %v1328_v62 = vadd.f32 %v1327_v59, %v1326_v56 }
 0x192   : > { %v1336_v0 = vsel %vm1333_vm3, %v1332_v60, %v1328_v62  ;;  %v2745_v60 = vmov 1966171168  }
 0x193   : > { %v1341_v21 = vsel %vm1337_vm4, %v1336_v0, 0.0  ;;  %v1732_v62 = vunpack.c.l.s4 %v2745_v60 }
 0x194   : > { %v1342_v1 = vadd.f32 %v1341_v21, %v1340_v63 }
 0x195   : > { %v1733_v21 = vunpack.c.0.s8 %v1732_v62 }
 0x196   : > { %1343 = vadd.xlane.f32.xlu0 %v1342_v1 }
 0x1b9   : > { %v2232_v2 = vpop.f32.mrb[0].mxu0 }
 0x1ba   : > { %v2267_v3 = vpop.f32.mrb[0].mxu1  ;;  %v2233_v4 = vpop.f32.mrb[1].mxu0 }
 0x1bb   : > { %v2234_v5 = vadd.f32 %v2233_v4, %v2232_v2  ;;  %v2268_v6 = vpop.f32.mrb[1].mxu1  ;;  %v1736_v4 = vsub.s32 %v1733_v21, %v3061_v61 }
 0x1bc   : > { %v2269_v7 = vadd.f32 %v2268_v6, %v2267_v3 }
 0x1be   : > { %v1632_v8 = vadd.f32 %v2269_v7, %v2234_v5 }
 0x1c9   : > { %v1701_v9 = vpop.f32.mrb[2].mxu0 }
 0x1ca   : > { %v1702_v10 = vadd.f32 %v1701_v9, %v1632_v8  ;;  %v2297_v11 = vpop.f32.mrb[3].mxu0 }
 0x1cc   : > { %v1706_v13 = vmul.f32 %v1705_v12, %v1702_v10 }
 0x1ce   : > { %v1708_v15 = vadd.f32 %v1707_v14, %v1706_v13 }
 0x1d0   : > { %v1709_v16 = vmul.f32 %v1708_v15, %v1708_v15 }
 0x1d2   : > { %v1710_v17 = vsel %vm1329_vm2, %v1709_v16, 0.0 }
 0x1d3   : > { %1711 = vadd.xlane.f32.xlu0 %v1710_v17 }
 0x223   : > { %v1344_v19 = vpop.xlane.xlu0 %1343 }
 0x224   : > { %v1345_v20 = vmul.f32 6.781684e-06, %v1344_v19 }
 0x226   : > { %v1347_v22 = vmul.f32 %v1346_v18, %v1345_v20 }
 0x228   : > { %v1349_v23 = vsel %vm1348_vm5, %v1347_v22, 0.0 }
 0x229   : > { %v1350_v24 = vrot.slane %v1349_v23, 4 }
 0x22b   : > { %v1351_v25 = vadd.f32 %v1350_v24, %v1349_v23 }
 0x22d   : > { %v1352_v26 = vrot.slane %v1351_v25, 2 }
 0x22f   : > { %v1353_v27 = vadd.f32 %v1352_v26, %v1351_v25 }
 0x231   : > { %v1354_v28 = vrot.slane %v1353_v27, 1 }
 0x233   : > { %v1355_v31 = vadd.f32 %v1354_v28, %v1353_v27 }
 0x235   : > { %v1357_v32 = vadd.f32 %v1356_v29, %v1355_v31 }
 0x237   : > { %v1363_v34 = vrot.slane %v1357_v32, %v1362_v48 }
 0x239   : > { %v1364_v35 = vmul.f32 %v1363_v34, %v1359_v33 }
 0x23b   : > { %v1365_v36 = vmul.f32 %v1364_v35, %v1364_v35 }
 0x23d   : > { %v1367_v37 = vsel %vm1366_vm6, %v1365_v36, 0.0 }
 0x23e   : > { %1368 = vadd.xlane.f32.xlu1 %v1367_v37 }
 0x260   : > { %v1712_v38 = vpop.xlane.xlu0 %1711 }
 0x261   : > { %2487 = vrsqrt.f32 %v1712_v38  ;;  %vm1715_vm7 = vcmp.eq.f32.partialorder %v1712_v38, inf  ;;  %v1718_v41 = vand.u32 2147483648, %v1712_v38  ;;  %vm1717_vm8 = vcmp.eq.f32.partialorder %v1712_v38, 0.0 }
 0x26b   : > { %v2488_v39 = vpop.eup %2487 }
 0x26c   : > { %v1714_v40 = vmul.f32 %v2488_v39, %v1712_v38 }
 0x26e   : > { %v1716_v42 = vsel %vm1715_vm7, %v1712_v38, %v1714_v40 }
 0x26f   : > { %v1719_v43 = vsel %vm1717_vm8, %v1718_v41, %v1716_v42 }
 0x270   : > { %v1720_v44 = vadd.f32 1e-10, %v1719_v43 }
 0x272   : > { %2489 = vrcp.f32 %v1720_v44 }
 0x27c   : > { %v2490_v45 = vpop.eup %2489 }
 0x27d   : > { %v1722_v46 = vmul.f32 %v2490_v45, %v1708_v15 }
 0x27f   : > { %1724 = vrot.lane.b32.xlu1 %v1722_v46, %s2744_s23 }
 0x2cb   : > { %v1369_v48 = vpop.xlane.xlu1 %1368 }
 0x2cc   : > { %2491 = vrsqrt.f32 %v1369_v48  ;;  %vm1372_vm9 = vcmp.eq.f32.partialorder %v1369_v48, inf  ;;  %v1375_v50 = vand.u32 2147483648, %v1369_v48  ;;  %vm1374_vm10 = vcmp.eq.f32.partialorder %v1369_v48, 0.0 }
 0x2d6   : > { %v2492_v49 = vpop.eup %2491 }
 0x2d7   : > { %v1371_v51 = vmul.f32 %v2492_v49, %v1369_v48 }
 0x2d9   : > { %v1373_v52 = vsel %vm1372_vm9, %v1369_v48, %v1371_v51 }
 0x2da   : > { %v1376_v53 = vsel %vm1374_vm10, %v1375_v50, %v1373_v52 }
 0x2db   : > { %v1377_v54 = vadd.f32 1e-10, %v1376_v53 }
 0x2dd   : > { %2493 = vrcp.f32 %v1377_v54 }
 0x2e7   : > { %v2494_v55 = vpop.eup %2493 }
 0x2e8   : > { %v1379_v56 = vmul.f32 %v2494_v55, %v1364_v35 }
 0x2ea   : > { %v1380_v57 = vsel %vm1366_vm6, %v1379_v56, 0.0 }
 0x2eb   : > { %v1381_v58 = vrot.slane %v1380_v57, 4 }
 0x2ed   : > { %v1382_v59 = vadd.f32 %v1381_v58, %v1380_v57 }
 0x2ef   : > { %v1383_v63 = vrot.slane %v1382_v59, 2 }
 0x2f1   : > { %v1384_v0 = vadd.f32 %v1383_v63, %v1382_v59  ;;  %v1725_v2 = vpop.permute.xlu1 %1724 }
 0x2f3   : > { %v1385_v1 = vrot.slane %v1384_v0, 1 }
 0x2f5   : > { %v1386_v3 = vadd.f32 %v1385_v1, %v1384_v0 }
 0x2f7   : > { %v1728_v5 = vsel %vm1727_vm11, %v1386_v3, %v1725_v2 }
 0x2f8   : > { %v1730_v6 = vcombine.low %v1728_v5, %v1725_v2 }
 0x2fa   : > { %v1737_v7 = vrot.slane %v1730_v6, %v1736_v4 }
 0x2fc   : > { %v1744_v8 = vrot.slane %v1737_v7, %v1736_v4 }
 0x2fe   : > { %1750 = vst.msk [vmem:[%s417_s15] sm:$0x3] %vm1748_vm12, %v1744_v8 }
 0x2ff PF: > { %p22_p2 = scmp.ge.s32.totalorder %s2967_s25, 4   ;;  %s3568_s27 = smov %s2720_s28 }
 0x300   : > { %s3569_s28 = smov %s2724_s29  ;;  %s3570_s29 = smov %s2979_s14 }
 0x301   : > { %s3571_s30 = smov %s2967_s25  ;;  %24 = sbr.rel (!%p22_p2) target bundleno = 7 (0x7), region = 122 }
 0x308   :  { %1770 = vsyncpa [#allocation3], 1 }
 0x309   :  { %1772 = vsyncpa [#allocation3 + $0x1], 1 }
 0x30a   :  { %1773 = vsyncpa [#allocation7], 1 }
 0x30b   :  { %1774 = vsyncpa [#allocation10], 1 }
 0x30c   :  { %1775 = vsyncpa [#allocation13], 1 }
 0x30d   :  { %1776 = vsyncpa [#allocation4], 1 }
 0x30e   :  { %1778 = vsyncpa [#allocation4 + $0x1], 1 }

</bundles_post_ra>
